<compile_context>
chip_gen: v6e
topology: v6e:2x2x1
jax: 0.10.0
libtpu: 0.0.40
codegen_flags: <defaults>
</compile_context>

<pallas_src>
import functools

import jax
import jax.numpy as jnp
from jax.experimental import pallas as pl
from jax.experimental.pallas import tpu as pltpu


# ---------------------------------------------------------------------------
# helpers
# ---------------------------------------------------------------------------
def _round_up(x, m):
    return ((x + m - 1) // m) * m


def _vmem_capacity_bytes():
    """Physical VMEM of this generation; conservative fallback if unknown."""
    try:
        cap = int(getattr(pltpu.get_tpu_info(), "vmem_capacity_bytes"))
        if cap > 0:
            return cap
    except Exception:
        pass
    return 64 << 20  # v7x per-TensorCore size: safe lower bound everywhere


def _divisor_tiles(dim, base=128):
    """Multiples of `base` that divide `dim`, descending. Requires dim % base == 0."""
    return [d for d in range(dim, base - 1, -base) if dim % d == 0]


def _largest_divisor_tile(dim, base, cap):
    for d in _divisor_tiles(dim, base):
        if d <= cap:
            return d
    return base


def _matmul_vmem_bytes(k_dim, tm, tk, tn, b_resident, out_itemsize):
    """Worst-case VMEM use of one tiled matmul call (2 buffers per input)."""
    a_bytes = 2 * tm * tk * 2                                   # streamed lhs (bf16)
    b_bytes = (2 * k_dim * tn * 2) if b_resident else (2 * tk * tn * 2)
    o_bytes = 2 * tm * tn * out_itemsize
    return a_bytes + b_bytes + o_bytes + tm * tn * 4 + 2 * tn * 4


# ---------------------------------------------------------------------------
# Path 1: whole graph resident in VMEM (small / medium N) -- adj read once
# ---------------------------------------------------------------------------
def _resident_kernel(adj_ref, x_ref, w_ref, b_ref, o_ref, *, k):
    # Linear first: h0 = X @ W^T  (bf16 operands, f32 accumulation on MXU).
    h = jnp.dot(x_ref[...], w_ref[...], preferred_element_type=jnp.float32)
    adj = adj_ref[...]                       # bf16, VMEM-resident for all k hops
    for _ in range(k):
        h = jnp.dot(adj, h.astype(adj.dtype), preferred_element_type=jnp.float32)
    o_ref[...] = (h + b_ref[...]).astype(o_ref.dtype)


def _sgconv_resident(adj_p, x_p, w_t_p, b_p, k, out_dtype, vmem_limit):
    n_pad = adj_p.shape[0]
    f_out_pad = w_t_p.shape[1]
    # memory_space=VMEM pins the whole operand in VMEM with a single buffer
    # (no pipeline double-buffering of the N^2 adjacency slab).
    vspec = pl.BlockSpec(memory_space=pltpu.MemorySpace.VMEM)
    return pl.pallas_call(
        functools.partial(_resident_kernel, k=k),
        out_shape=jax.ShapeDtypeStruct((n_pad, f_out_pad), out_dtype),
        in_specs=[vspec, vspec, vspec, vspec],
        out_specs=vspec,
        compiler_params=pltpu.CompilerParams(vmem_limit_bytes=vmem_limit),
    )(adj_p, x_p, w_t_p, b_p)


# ---------------------------------------------------------------------------
# Path 2: tiled matmul with (optionally) VMEM-resident RHS
# ---------------------------------------------------------------------------
def _mm_bias_kernel(a_ref, b_ref, bias_ref, o_ref, acc_ref, *, tk, b_resident):
    kk = pl.program_id(2)

    @pl.when(kk == 0)
    def _():
        acc_ref[...] = jnp.zeros_like(acc_ref)

    if b_resident:
        # Whole-K RHS is resident in VMEM; slice the K-chunk in-kernel.
        k0 = pl.multiple_of(kk * tk, 128)
        b_blk = b_ref[pl.ds(k0, tk), :]
    else:
        b_blk = b_ref[...]
    acc_ref[...] += jnp.dot(a_ref[...], b_blk, preferred_element_type=jnp.float32)

    @pl.when(kk == pl.num_programs(2) - 1)
    def _():
        o_ref[...] = (acc_ref[...] + bias_ref[...]).astype(o_ref.dtype)


def _matmul_bias(a, b, bias, out_dtype, *, tm, tn, tk, b_resident, vmem_limit):
    """out = a @ b + bias, f32 accumulation.  a:(M,K) b:(K,N) bias:(1,N)."""
    m, k_dim = a.shape
    _, n = b.shape
    assert m % tm == 0 and n % tn == 0 and k_dim % tk == 0
    # Grid order (j, i, kk): the resident RHS block index (0, j) only changes
    # when j changes, so the RHS is fetched from HBM exactly N/tn times total
    # (once when tn == N) and the streamed lhs hits its HBM-traffic floor.
    grid = (n // tn, m // tm, k_dim // tk)
    if b_resident:
        b_spec = pl.BlockSpec((k_dim, tn), lambda j, i, kk: (0, j))
    else:
        b_spec = pl.BlockSpec((tk, tn), lambda j, i, kk: (kk, j))
    return pl.pallas_call(
        functools.partial(_mm_bias_kernel, tk=tk, b_resident=b_resident),
        out_shape=jax.ShapeDtypeStruct((m, n), out_dtype),
        grid_spec=pltpu.PrefetchScalarGridSpec(
            num_scalar_prefetch=0,
            grid=grid,
            in_specs=[
                pl.BlockSpec((tm, tk), lambda j, i, kk: (i, kk)),   # streamed lhs
                b_spec,                                             # rhs
                pl.BlockSpec((1, tn), lambda j, i, kk: (0, j)),     # bias
            ],
            out_specs=pl.BlockSpec((tm, tn), lambda j, i, kk: (i, j)),
            scratch_shapes=[pltpu.VMEM((tm, tn), jnp.float32)],
        ),
        compiler_params=pltpu.CompilerParams(
            dimension_semantics=("parallel", "parallel", "arbitrary"),
            vmem_limit_bytes=vmem_limit,
        ),
    )(a, b, bias)


def _plan_matmul(k_dim, n_out, tm, budget, out_itemsize):
    """Pick (tn, tk, rhs_resident) maximizing RHS residency within budget."""
    tk = _largest_divisor_tile(k_dim, 128, 4096)
    for tn in _divisor_tiles(n_out, 128):          # prefer a single j-step
        if _matmul_vmem_bytes(k_dim, tm, tk, tn, True, out_itemsize) <= budget:
            return tn, tk, True
    # RHS too large to keep resident even at tn=128: stream both operands.
    return (_largest_divisor_tile(n_out, 128, 512),
            _largest_divisor_tile(k_dim, 128, 1024), False)


def _sgconv_tiled(adj_p, x_p, w_t_p, b_p, k, out_dtype, *, budget, vmem_limit_cap, tm):
    n_pad = adj_p.shape[0]
    f_in_pad = x_p.shape[1]
    f_out_pad = w_t_p.shape[1]
    zero_b = jnp.zeros_like(b_p)

    def limit(need):
        return max(min(2 * need + (16 << 20), vmem_limit_cap), min(need + (8 << 20),
                                                                   vmem_limit_cap))

    # Linear first (no bias yet): h0 = X @ W^T, kept in bf16 for the hops.
    tn0, tk0, res0 = _plan_matmul(f_in_pad, f_out_pad, tm, budget, 2)
    h = _matmul_bias(x_p, w_t_p, zero_b, jnp.bfloat16, tm=tm, tn=tn0, tk=tk0,
                     b_resident=res0,
                     vmem_limit=limit(_matmul_vmem_bytes(f_in_pad, tm, tk0, tn0, res0, 2)))

    # Hop matmuls: h <- A @ h with h VMEM-resident -> adj streamed once per hop.
    tn, tk, res = _plan_matmul(n_pad, f_out_pad, tm, budget, 4)
    hop_limit = limit(_matmul_vmem_bytes(n_pad, tm, tk, tn, res, 4))
    # TODO(synk): the k hop calls could be fused into one pallas_call with an
    #             HBM ping-pong via input_output_aliases; kept separate for
    #             simplicity (secondary to the adj stream for small F_out).
    for i in range(k):
        last = (i == k - 1)
        h = _matmul_bias(adj_p, h, b_p if last else zero_b,
                         out_dtype if last else jnp.bfloat16,
                         tm=tm, tn=tn, tk=tk, b_resident=res, vmem_limit=hop_limit)
    return h


# ---------------------------------------------------------------------------
# public wrapper
# ---------------------------------------------------------------------------
def sgconv_forward(x, adj, weight, bias, k=4, *, force_tiled=False):
    """x: (N, F_in), adj: (N, N), weight: (F_out, F_in), bias: (F_out,)."""
    n, f_in = x.shape
    f_out = weight.shape[0]
    out_dtype = x.dtype

    row_tile = 256                              # uniform row tiles (no 128 collapse)
    n_pad = _round_up(n, row_tile)
    f_in_pad = _round_up(f_in, 128)
    f_out_pad = _round_up(f_out, 128)

    cdt = jnp.bfloat16  # MXU operand dtype (f32 accumulation inside kernels)
    x_p = jnp.zeros((n_pad, f_in_pad), cdt).at[:n, :f_in].set(x.astype(cdt))
    adj_p = jnp.zeros((n_pad, n_pad), cdt).at[:n, :n].set(adj.astype(cdt))
    w_t_p = jnp.zeros((f_in_pad, f_out_pad), cdt).at[:f_in, :f_out].set(
        weight.T.astype(cdt))
    b_p = jnp.zeros((1, f_out_pad), jnp.float32).at[0, :f_out].set(
        bias.astype(jnp.float32))

    # Generation-aware VMEM budgets (v5e/v6e: 128 MiB physical; v7x: 64 MiB/TC).
    vmem_cap = _vmem_capacity_bytes()
    vmem_limit_cap = min(int(vmem_cap * 0.80), 100 << 20)   # ~51 MiB v7x, 100 MiB v5e/v6e
    budget = vmem_limit_cap - (12 << 20)                    # headroom for Mosaic scratch

    # Truthful resident-path estimate: all operands (single-buffered), the f32
    # output, per-hop f32 h temps + their bf16 casts, plus a 15% margin.
    hf = n_pad * f_out_pad
    resident_bytes = int(1.15 * (adj_p.size * 2 + x_p.size * 2 + w_t_p.size * 2
                                 + f_out_pad * 4 + hf * 4 + 2 * hf * 4 + hf * 2))

    if (not force_tiled) and resident_bytes <= budget:
        # NOTE: the fused resident kernel runs on one TensorCore (grid=()); it
        # is only chosen for graphs small enough that this is a non-issue, and
        # it reads the adjacency from HBM exactly once for all k hops.
        out_p = _sgconv_resident(adj_p, x_p, w_t_p, b_p, k, out_dtype,
                                 vmem_limit=vmem_limit_cap)
    else:
        out_p = _sgconv_tiled(adj_p, x_p, w_t_p, b_p, k, out_dtype,
                              budget=budget, vmem_limit_cap=vmem_limit_cap,
                              tm=row_tile)

    return out_p[:n, :f_out]


# ---------------------------------------------------------------------------
# demo / correctness check
# ---------------------------------------------------------------------------
if __name__ == "__main__":
    key = jax.random.PRNGKey(0)
    k_x, k_a, k_w, k_b = jax.random.split(key, 4)

    # Small, module-consistent shapes: N nodes, in_features -> out_features.
    N, F_IN, F_OUT, K_HOPS = 64, 32, 16, 4

    x = jax.random.normal(k_x, (N, F_IN), dtype=jnp.float32)

    # Deterministic dense "adjacency": sparse-ish mask + self-loops, row-normalized.
    raw = jax.random.uniform(k_a, (N, N), dtype=jnp.float32)
    mask = (raw > 0.85).astype(jnp.float32)
    adj = mask + jnp.eye(N, dtype=jnp.float32)
    adj = adj / jnp.sum(adj, axis=1, keepdims=True)

    # nn.Linear(in_features, out_features) parameters, deterministic init.
    bound = 1.0 / (F_IN ** 0.5)
    weight = jax.random.uniform(k_w, (F_OUT, F_IN), minval=-bound, maxval=bound,
                                dtype=jnp.float32)
    bias = jax.random.uniform(k_b, (F_OUT,), minval=-bound, maxval=bound,
                              dtype=jnp.float32)

    # Reference in plain JAX (f32, original PyTorch op order).
    h = x
    for _ in range(K_HOPS):
        h = adj @ h
    ref = h @ weight.T + bias

    # Resident (small-graph) path.
    out_res = jax.block_until_ready(sgconv_forward(x, adj, weight, bias, k=K_HOPS))
    # Tiled (large-graph) path, forced for coverage at this small shape.
    out_tiled = jax.block_until_ready(
        sgconv_forward(x, adj, weight, bias, k=K_HOPS, force_tiled=True))

    assert out_res.shape == (N, F_OUT)
    assert out_tiled.shape == (N, F_OUT)
    # bf16 MXU operands over k=4 hops -> relaxed tolerance vs f32 reference.
    assert jnp.allclose(out_res, ref, atol=3e-2, rtol=3e-2), \
        float(jnp.max(jnp.abs(out_res - ref)))
    assert jnp.allclose(out_tiled, ref, atol=3e-2, rtol=3e-2), \
        float(jnp.max(jnp.abs(out_tiled - ref)))

    print("KERNEL_OK")
</pallas_src>

<mosaic_0001>
module attributes {stable_mosaic.version = 11 : i64} {
  func.func @_resident_kernel(%arg0: memref<256x256xbf16, #tpu.memory_space<vmem>>, %arg1: memref<256x128xbf16, #tpu.memory_space<vmem>>, %arg2: memref<128x128xbf16, #tpu.memory_space<vmem>>, %arg3: memref<1x128xf32, #tpu.memory_space<vmem>>, %arg4: memref<256x128xf32, #tpu.memory_space<vmem>>) attributes {dimension_semantics = [], scalar_prefetch = 0 : i64, scratch_operands = 0 : i64, tpu.core_type = #tpu.core_type<tc>} {
    %c0 = arith.constant 0 : index
    %c0_0 = arith.constant 0 : index
    %0 = vector.load %arg1[%c0, %c0_0] : memref<256x128xbf16, #tpu.memory_space<vmem>>, vector<256x128xbf16>
    %c0_1 = arith.constant 0 : index
    %c0_2 = arith.constant 0 : index
    %1 = vector.load %arg2[%c0_1, %c0_2] : memref<128x128xbf16, #tpu.memory_space<vmem>>, vector<128x128xbf16>
    %cst = arith.constant dense<0.000000e+00> : vector<256x128xf32>
    %2 = tpu.matmul %0, %1, %cst {dimension_numbers = #tpu.dot_dimension_numbers<[1], [0], [0], [1], [0, 0, 1, 1], [], []>} : vector<256x128xbf16>, vector<128x128xbf16>, vector<256x128xf32> -> vector<256x128xf32>
    %c0_3 = arith.constant 0 : index
    %c0_4 = arith.constant 0 : index
    %3 = vector.load %arg0[%c0_3, %c0_4] : memref<256x256xbf16, #tpu.memory_space<vmem>>, vector<256x256xbf16>
    %4 = arith.truncf %2 : vector<256x128xf32> to vector<256x128xbf16>
    %cst_5 = arith.constant dense<0.000000e+00> : vector<256x128xf32>
    %5 = tpu.matmul %3, %4, %cst_5 {dimension_numbers = #tpu.dot_dimension_numbers<[1], [0], [0], [1], [0, 0, 1, 1], [], []>} : vector<256x256xbf16>, vector<256x128xbf16>, vector<256x128xf32> -> vector<256x128xf32>
    %6 = arith.truncf %5 : vector<256x128xf32> to vector<256x128xbf16>
    %cst_6 = arith.constant dense<0.000000e+00> : vector<256x128xf32>
    %7 = tpu.matmul %3, %6, %cst_6 {dimension_numbers = #tpu.dot_dimension_numbers<[1], [0], [0], [1], [0, 0, 1, 1], [], []>} : vector<256x256xbf16>, vector<256x128xbf16>, vector<256x128xf32> -> vector<256x128xf32>
    %8 = arith.truncf %7 : vector<256x128xf32> to vector<256x128xbf16>
    %cst_7 = arith.constant dense<0.000000e+00> : vector<256x128xf32>
    %9 = tpu.matmul %3, %8, %cst_7 {dimension_numbers = #tpu.dot_dimension_numbers<[1], [0], [0], [1], [0, 0, 1, 1], [], []>} : vector<256x256xbf16>, vector<256x128xbf16>, vector<256x128xf32> -> vector<256x128xf32>
    %10 = arith.truncf %9 : vector<256x128xf32> to vector<256x128xbf16>
    %cst_8 = arith.constant dense<0.000000e+00> : vector<256x128xf32>
    %11 = tpu.matmul %3, %10, %cst_8 {dimension_numbers = #tpu.dot_dimension_numbers<[1], [0], [0], [1], [0, 0, 1, 1], [], []>} : vector<256x256xbf16>, vector<256x128xbf16>, vector<256x128xf32> -> vector<256x128xf32>
    %c0_9 = arith.constant 0 : index
    %c0_10 = arith.constant 0 : index
    %12 = vector.load %arg3[%c0_9, %c0_10] : memref<1x128xf32, #tpu.memory_space<vmem>>, vector<1x128xf32>
    %13 = vector.broadcast %12 : vector<1x128xf32> to vector<256x128xf32>
    %14 = arith.addf %11, %13 : vector<256x128xf32>
    %c0_11 = arith.constant 0 : index
    %c0_12 = arith.constant 0 : index
    %15 = vector.load %arg4[%c0_11, %c0_12] : memref<256x128xf32, #tpu.memory_space<vmem>>, vector<256x128xf32>
    tpu.vector_store %arg4[%c0_11, %c0_12], %14 {strides = array<i32>} : memref<256x128xf32, #tpu.memory_space<vmem>>, vector<256x128xf32>,
    return
  }
}

</mosaic_0001>

<bundles_post_ra>
// kernel: tpu_custom_call.1
= control target key start
LH: loop header
LB: loop body
LE: loop exit
PB: predicated region body
PF: predicated region fallthrough
CT: control target
= control target key end

     0   :  { %9 = vsyncpa [#allocation3], 0  ;;  %s2598_s0 = inlined_call_operand.hbm [shape: bf16[256,256], index: 0, kind: input, shape index: {}]   ;;  %s2599_s1 = inlined_call_operand.hbm [shape: bf16[256,128], index: 1, kind: input, shape index: {}]   ;;  %s2600_s2 = inlined_call_operand.hbm [shape: bf16[128,128], index: 2, kind: input, shape index: {}]   ;;  %s2601_s3 = inlined_call_operand.vmem [shape: f32[1,128], index: 3, kind: input, shape index: {}]   ;;  %s2602_s4 = inlined_call_operand.hbm [shape: f32[256,128], index: 4, kind: output, shape index: {}]  }
   0x1   :  { %10 = vsyncpa [#allocation6], 0 }
   0x2   :  { %11 = vsyncpa [#allocation4], 0  ;;  %s2129_s15 = smov [#allocation5]  }
   0x3   :  { %s29_s16 = sshll.u32 %s2129_s15, 4  ;;  %s30_s16 = int_to_ptr.vmem [resolvable:$true] %s29_s16 }
   0x4   :  { %s2051_s17 = scalar_lea.vmem %s30_s16, 2048  ;;  %p2056_p1 = scmp.lt.s32.totalorder %s30_s16, %s30_s16 }
   0x5   :  { %p2052_p0 = scmp.ne.s32.totalorder %s30_s16, %s2051_s17  ;;  %p2057_p2 = scmp.lt.s32.totalorder %s2051_s17, %s2051_s17 }
   0x7   :  { %p2058_p3 = por %p2057_p2, %p2056_p1 }
   0x9   :  { %p2059_p4 = pnand %p2058_p3, %p2052_p0 }
   0xb   :  { %2062 = shalt.err (!%p2059_p4)
}
   0xc   :  { %s2130_s18 = smov 64   ;;  %s2131_s19 = smov 4  }
   0xd   :  { %35 = dma.hbm_to_vmem [thread:$0]  %s2599_s1, 2048, %s30_s16, [#allocation6], %s2130_s18, %s2130_s18, %s2131_s19  }
   0xe   :  { %s2132_s22 = smov [#allocation2]  }
   0xf   :  { %s17_s23 = sshll.u32 %s2132_s22, 4  ;;  %s18_s23 = int_to_ptr.vmem [resolvable:$true] %s17_s23 }
  0x10   :  { %s2071_s24 = scalar_lea.vmem %s18_s23, 4096  ;;  %p2076_p6 = scmp.lt.s32.totalorder %s18_s23, %s18_s23 }
  0x11   :  { %p2072_p5 = scmp.ne.s32.totalorder %s18_s23, %s2071_s24  ;;  %p2077_p7 = scmp.lt.s32.totalorder %s2071_s24, %s2071_s24 }
  0x13   :  { %p2078_p8 = por %p2077_p7, %p2076_p6 }
  0x15   :  { %p2079_p9 = pnand %p2078_p8, %p2072_p5 }
  0x17   :  { %2082 = shalt.err (!%p2079_p9)
}
  0x18   :  { %s2133_s25 = smov 128   ;;  %s2134_s26 = smov 8  }
  0x19   :  { %23 = dma.hbm_to_vmem [thread:$0]  %s2598_s0, 4096, %s18_s23, [#allocation3], %s2133_s25, %s2133_s25, %s2134_s26  }
  0x1a   :  { %s2135_s1 = smov [#allocation7]  }
  0x1b   :  { %s41_s29 = sshll.u32 %s2135_s1, 4  ;;  %s42_s29 = int_to_ptr.vmem [resolvable:$true] %s41_s29 }
  0x1c   :  { %s2091_s30 = scalar_lea.vmem %s42_s29, 1024  ;;  %p2096_p11 = scmp.lt.s32.totalorder %s42_s29, %s42_s29 }
  0x1d   :  { %p2092_p10 = scmp.ne.s32.totalorder %s42_s29, %s2091_s30  ;;  %p2097_p12 = scmp.lt.s32.totalorder %s2091_s30, %s2091_s30 }
  0x1f   :  { %p2098_p13 = por %p2097_p12, %p2096_p11 }
  0x21   :  { %p2099_p0 = pnand %p2098_p13, %p2092_p10 }
  0x23   :  { %2102 = shalt.err (!%p2099_p0)
}
  0x24   :  { %47 = dma.hbm_to_vmem [thread:$0]  %s2600_s2, 1024, %s42_s29, [#allocation6], %s2130_s18, %s2130_s18, %s2131_s19  }
  0x25   :  { %2123 = dma.done.wait [#allocation3], 4096  }
  0x26   :  { %2124 = vsyncadd [#allocation3], 4294963200 }
  0x27   :  { %2125 = dma.done.wait [#allocation6], 3072  }
  0x28   :  { %2126 = vsyncadd [#allocation6], 4294964224  ;;  %v1971_v0 = vld [vmem:[#allocation7 + $0x38] sm:$0xff]   ;;  %v1972_v1 = vld [vmem:[#allocation7 + $0x30] sm:$0xff]  }
  0x29   :  { %1899 = vmatprep.subr.bf16.mxu0 %v1971_v0  ;;  %1947 = vmatprep.subr.bf16.mxu1 %v1971_v0  ;;  %v1973_v2 = vld [vmem:[#allocation7 + $0x28] sm:$0xff]   ;;  %v1974_v3 = vld [vmem:[#allocation7 + $0x20] sm:$0xff]   ;;  %v1975_v6 = vld [vmem:[#allocation7 + $0x18] sm:$0xff]  }
  0x2a   :  { %1900 = vmatpush3.bf16.msra.mxu0 %v1971_v0  ;;  %1955 = vmatpush3.bf16.msra.mxu1 %v1971_v0  ;;  %v1979_v4 = vld [vmem:[#allocation5] sm:$0xff]   ;;  %v1976_v7 = vld [vmem:[#allocation7 + $0x10] sm:$0xff]   ;;  %v1977_v8 = vld [vmem:[#allocation7 + $0x8] sm:$0xff]  }
  0x2b   :  { %1901 = vmatprep.subr.bf16.mxu0 %v1972_v1  ;;  %1948 = vmatprep.subr.bf16.mxu1 %v1972_v1  ;;  %v1980_v5 = vld [vmem:[#allocation5 + $0x40] sm:$0xff]   ;;  %v1981_v10 = vld [vmem:[#allocation5 + $0x8] sm:$0xff]   ;;  %v1983_v12 = vld [vmem:[#allocation5 + $0x10] sm:$0xff]  }
  0x2c   :  { %1915 = vmatprep.mubr.bf16.mxu0 %v1979_v4  ;;  %1931 = vmatprep.mubr.bf16.mxu1 %v1980_v5  ;;  %v1978_v9 = vld [vmem:[#allocation7] sm:$0xff]   ;;  %v1982_v11 = vld [vmem:[#allocation5 + $0x48] sm:$0xff]   ;;  %v1984_v13 = vld [vmem:[#allocation5 + $0x50] sm:$0xff]  }
  0x2d   :  { %v1985_v14 = vld [vmem:[#allocation5 + $0x18] sm:$0xff]   ;;  %v1987_v16 = vld [vmem:[#allocation5 + $0x20] sm:$0xff]   ;;  %v1989_v18 = vld [vmem:[#allocation5 + $0x28] sm:$0xff]  }
  0x2e   :  { %1902 = vmatpush3.bf16.msra.mxu0 %v1972_v1  ;;  %1956 = vmatpush3.bf16.msra.mxu1 %v1972_v1  ;;  %v1986_v15 = vld [vmem:[#allocation5 + $0x58] sm:$0xff]   ;;  %v1988_v17 = vld [vmem:[#allocation5 + $0x60] sm:$0xff]   ;;  %v1990_v19 = vld [vmem:[#allocation5 + $0x68] sm:$0xff]  }
  0x2f   :  { %1903 = vmatprep.subr.bf16.mxu0 %v1973_v2  ;;  %1949 = vmatprep.subr.bf16.mxu1 %v1973_v2  ;;  %v1991_v20 = vld [vmem:[#allocation5 + $0x30] sm:$0xff]   ;;  %v1993_v22 = vld [vmem:[#allocation5 + $0x38] sm:$0xff]   ;;  %v2174_v24 = vld [vmem:[#allocation2 + $0x4] ss:$8 sps:$4 sm:$0xff]  }
  0x30   :  { %v1992_v21 = vld [vmem:[#allocation5 + $0x70] sm:$0xff]   ;;  %v1994_v23 = vld [vmem:[#allocation5 + $0x78] sm:$0xff]   ;;  %2644 = vst [vmem:[#allocation12_spill] sm:$0xff] %v2174_v24 }
  0x32   :  { %1904 = vmatpush3.bf16.msra.mxu0 %v1973_v2  ;;  %1957 = vmatpush3.bf16.msra.mxu1 %v1973_v2 }
  0x33   :  { %1905 = vmatprep.subr.bf16.mxu0 %v1974_v3  ;;  %1950 = vmatprep.subr.bf16.mxu1 %v1974_v3 }
  0x36   :  { %1906 = vmatpush3.bf16.msra.mxu0 %v1974_v3  ;;  %1958 = vmatpush3.bf16.msra.mxu1 %v1974_v3 }
  0x37   :  { %1907 = vmatprep.subr.bf16.mxu0 %v1975_v6  ;;  %1951 = vmatprep.subr.bf16.mxu1 %v1975_v6 }
  0x3a   :  { %1908 = vmatpush3.bf16.msra.mxu0 %v1975_v6  ;;  %1959 = vmatpush3.bf16.msra.mxu1 %v1975_v6 }
  0x3b   :  { %1909 = vmatprep.subr.bf16.mxu0 %v1976_v7  ;;  %1952 = vmatprep.subr.bf16.mxu1 %v1976_v7 }
  0x3e   :  { %1910 = vmatpush3.bf16.msra.mxu0 %v1976_v7  ;;  %1960 = vmatpush3.bf16.msra.mxu1 %v1976_v7 }
  0x3f   :  { %1911 = vmatprep.subr.bf16.mxu0 %v1977_v8  ;;  %1953 = vmatprep.subr.bf16.mxu1 %v1977_v8 }
  0x42   :  { %1912 = vmatpush3.bf16.msra.mxu0 %v1977_v8  ;;  %1961 = vmatpush3.bf16.msra.mxu1 %v1977_v8 }
  0x43   :  { %1913 = vmatprep.subr.bf16.mxu0 %v1978_v9  ;;  %1954 = vmatprep.subr.bf16.mxu1 %v1978_v9 }
  0x46   :  { %1914 = vmatpush3.bf16.msra.mxu0 %v1978_v9  ;;  %1962 = vmatpush3.bf16.msra.mxu1 %v1978_v9  ;;  %v2178_v9 = vld [vmem:[#allocation2] ss:$8 sps:$4 sm:$0xff]  }
  0x49   :  { %1916 = vmatmul.mubr.bf16.vlgmr.msra.gmra.mxu0 %v1981_v10  ;;  %1932 = vmatmul.mubr.bf16.vlgmr.msra.gmra.mxu1 %v1982_v11  ;;  %v2180_v10 = vld [vmem:[#allocation2 + $0x14] ss:$8 sps:$4 sm:$0xff]   ;;  %v2184_v11 = vld [vmem:[#allocation2 + $0x10] ss:$8 sps:$4 sm:$0xff]  }
  0x4a   :  { %1919 = vmatprep.mubr.bf16.mxu0 %v1983_v12  ;;  %1935 = vmatprep.mubr.bf16.mxu1 %v1984_v13  ;;  %v2186_v12 = vld [vmem:[#allocation2 + $0x24] ss:$8 sps:$4 sm:$0xff]   ;;  %v2190_v13 = vld [vmem:[#allocation2 + $0x20] ss:$8 sps:$4 sm:$0xff]  }
  0x51   :  { %1920 = vmatmul.mubr.bf16.gmra.mxu0 %v1985_v14  ;;  %1936 = vmatmul.mubr.bf16.gmra.mxu1 %v1986_v15  ;;  %v2192_v14 = vld [vmem:[#allocation2 + $0x34] ss:$8 sps:$4 sm:$0xff]   ;;  %v2196_v15 = vld [vmem:[#allocation2 + $0x30] ss:$8 sps:$4 sm:$0xff]  }
  0x52   :  { %1923 = vmatprep.mubr.bf16.mxu0 %v1987_v16  ;;  %1939 = vmatprep.mubr.bf16.mxu1 %v1988_v17  ;;  %v2198_v16 = vld [vmem:[#allocation2 + $0x44] ss:$8 sps:$4 sm:$0xff]   ;;  %v2202_v17 = vld [vmem:[#allocation2 + $0x40] ss:$8 sps:$4 sm:$0xff]  }
  0x59   :  { %1924 = vmatmul.mubr.bf16.gmra.mxu0 %v1989_v18  ;;  %1940 = vmatmul.mubr.bf16.gmra.mxu1 %v1990_v19  ;;  %v2204_v18 = vld [vmem:[#allocation2 + $0x54] ss:$8 sps:$4 sm:$0xff]   ;;  %v2208_v19 = vld [vmem:[#allocation2 + $0x50] ss:$8 sps:$4 sm:$0xff]  }
  0x5a   :  { %1927 = vmatprep.mubr.bf16.mxu0 %v1991_v20  ;;  %1943 = vmatprep.mubr.bf16.mxu1 %v1992_v21  ;;  %v2210_v20 = vld [vmem:[#allocation2 + $0x64] ss:$8 sps:$4 sm:$0xff]   ;;  %v2214_v21 = vld [vmem:[#allocation2 + $0x60] ss:$8 sps:$4 sm:$0xff]  }
  0x5b   :  { %2645 = vst [vmem:[#allocation13_spill] sm:$0xff] %v2210_v20  ;;  %2646 = vst [vmem:[#allocation14_spill] sm:$0xff] %v2214_v21 }
  0x61   :  { %1928 = vmatmul.mubr.bf16.gmra.mxu0 %v1993_v22  ;;  %1944 = vmatmul.mubr.bf16.gmra.mxu1 %v1994_v23  ;;  %v2216_v22 = vld [vmem:[#allocation2 + $0x74] ss:$8 sps:$4 sm:$0xff]   ;;  %v2220_v23 = vld [vmem:[#allocation2 + $0x70] ss:$8 sps:$4 sm:$0xff]  }
  0x62   :  { %653 = vmatprep.mubr.bf16.mxu1 %v2174_v24  ;;  %830 = vmatprep.mubr.bf16.mxu0 %v2174_v24  ;;  %2647 = vst [vmem:[#allocation15_spill] sm:$0xff] %v2216_v22  ;;  %2648 = vst [vmem:[#allocation16_spill] sm:$0xff] %v2220_v23 }
 0x109   :  { %v1917_v25 = vpop.f32.mrf.mxu0  ;;  %v1933_v26 = vpop.f32.mrf.mxu1 }
 0x10b   :  { %v286_v27 = vpop.f32.mrf.mxu0  ;;  %v350_v28 = vpop.f32.mrf.mxu1 }
 0x10d   :  { %v1918_v29 = vpop.f32.mrf.mxu0  ;;  %v1934_v30 = vpop.f32.mrf.mxu1 }
 0x10e   :  { %v454_v5 = vpack.c.bf16 %v1934_v30, %v1933_v26  ;;  %v446_v6 = vpack.c.bf16 %v1918_v29, %v1917_v25  ;;  %v2222_v25 = vld [vmem:[#allocation2 + $0x84] ss:$8 sps:$4 sm:$0xff]   ;;  %v2226_v26 = vld [vmem:[#allocation2 + $0x80] ss:$8 sps:$4 sm:$0xff]  }
 0x10f   :  { %v289_v31 = vpop.f32.mrf.mxu0  ;;  %v353_v32 = vpop.f32.mrf.mxu1  ;;  %2649 = vst [vmem:[#allocation17_spill] sm:$0xff] %v2222_v25  ;;  %2650 = vst [vmem:[#allocation18_spill] sm:$0xff] %v2226_v26  ;;  %v2234_v29 = vld [vmem:[#allocation2 + $0xa4] ss:$8 sps:$4 sm:$0xff]   ;;  %v2238_v30 = vld [vmem:[#allocation2 + $0xa0] ss:$8 sps:$4 sm:$0xff]  }
 0x110   :  { %v453_v7 = vpack.c.bf16 %v353_v32, %v350_v28  ;;  %v445_v8 = vpack.c.bf16 %v289_v31, %v286_v27  ;;  %v2228_v27 = vld [vmem:[#allocation2 + $0x94] ss:$8 sps:$4 sm:$0xff]   ;;  %v2232_v28 = vld [vmem:[#allocation2 + $0x90] ss:$8 sps:$4 sm:$0xff]   ;;  %2653 = vst [vmem:[#allocation21_spill] sm:$0xff] %v2234_v29  ;;  %2654 = vst [vmem:[#allocation22_spill] sm:$0xff] %v2238_v30 }
 0x111   :  { %v1921_v33 = vpop.f32.mrf.mxu0  ;;  %v1937_v34 = vpop.f32.mrf.mxu1  ;;  %2651 = vst [vmem:[#allocation19_spill] sm:$0xff] %v2228_v27  ;;  %2652 = vst [vmem:[#allocation20_spill] sm:$0xff] %v2232_v28  ;;  %v2240_v31 = vld [vmem:[#allocation2 + $0xb4] ss:$8 sps:$4 sm:$0xff]   ;;  %v2244_v32 = vld [vmem:[#allocation2 + $0xb0] ss:$8 sps:$4 sm:$0xff]  }
 0x112   :  { %2655 = vst [vmem:[#allocation23_spill] sm:$0xff] %v2240_v31  ;;  %2656 = vst [vmem:[#allocation24_spill] sm:$0xff] %v2244_v32 }
 0x113   :  { %v302_v35 = vpop.f32.mrf.mxu0  ;;  %v366_v36 = vpop.f32.mrf.mxu1 }
 0x115   :  { %v1922_v37 = vpop.f32.mrf.mxu0  ;;  %v1938_v38 = vpop.f32.mrf.mxu1 }
 0x116   :  { %v456_v1 = vpack.c.bf16 %v1938_v38, %v1937_v34  ;;  %v448_v2 = vpack.c.bf16 %v1922_v37, %v1921_v33  ;;  %v2246_v33 = vld [vmem:[#allocation2 + $0xc4] ss:$8 sps:$4 sm:$0xff]   ;;  %v2250_v34 = vld [vmem:[#allocation2 + $0xc0] ss:$8 sps:$4 sm:$0xff]  }
 0x117   :  { %v305_v39 = vpop.f32.mrf.mxu0  ;;  %v369_v40 = vpop.f32.mrf.mxu1  ;;  %2657 = vst [vmem:[#allocation25_spill] sm:$0xff] %v2246_v33  ;;  %2658 = vst [vmem:[#allocation26_spill] sm:$0xff] %v2250_v34  ;;  %v2258_v37 = vld [vmem:[#allocation2 + $0xe4] ss:$8 sps:$4 sm:$0xff]   ;;  %v2262_v38 = vld [vmem:[#allocation2 + $0xe0] ss:$8 sps:$4 sm:$0xff]  }
 0x118   :  { %v455_v3 = vpack.c.bf16 %v369_v40, %v366_v36  ;;  %v447_v4 = vpack.c.bf16 %v305_v39, %v302_v35  ;;  %v2252_v35 = vld [vmem:[#allocation2 + $0xd4] ss:$8 sps:$4 sm:$0xff]   ;;  %v2256_v36 = vld [vmem:[#allocation2 + $0xd0] ss:$8 sps:$4 sm:$0xff]   ;;  %2661 = vst [vmem:[#allocation29_spill] sm:$0xff] %v2258_v37  ;;  %2662 = vst [vmem:[#allocation30_spill] sm:$0xff] %v2262_v38 }
 0x119   :  { %v1925_v41 = vpop.f32.mrf.mxu0  ;;  %v1941_v42 = vpop.f32.mrf.mxu1  ;;  %2659 = vst [vmem:[#allocation27_spill] sm:$0xff] %v2252_v35  ;;  %2660 = vst [vmem:[#allocation28_spill] sm:$0xff] %v2256_v36  ;;  %v2264_v39 = vld [vmem:[#allocation2 + $0xf4] ss:$8 sps:$4 sm:$0xff]   ;;  %v2268_v40 = vld [vmem:[#allocation2 + $0xf0] ss:$8 sps:$4 sm:$0xff]  }
 0x11a   :  { %2663 = vst [vmem:[#allocation31_spill] sm:$0xff] %v2264_v39  ;;  %2664 = vst [vmem:[#allocation32_spill] sm:$0xff] %v2268_v40 }
 0x11b   :  { %v318_v43 = vpop.f32.mrf.mxu0  ;;  %v382_v44 = vpop.f32.mrf.mxu1 }
 0x11d   :  { %v1926_v45 = vpop.f32.mrf.mxu0  ;;  %v1942_v46 = vpop.f32.mrf.mxu1 }
 0x11e   :  { %v458_v61 = vpack.c.bf16 %v1942_v46, %v1941_v42  ;;  %v450_v62 = vpack.c.bf16 %v1926_v45, %v1925_v41 }
 0x11f   :  { %v321_v47 = vpop.f32.mrf.mxu0  ;;  %v385_v48 = vpop.f32.mrf.mxu1 }
 0x120   :  { %v457_v63 = vpack.c.bf16 %v385_v48, %v382_v44  ;;  %v449_v0 = vpack.c.bf16 %v321_v47, %v318_v43 }
 0x121   :  { %v1929_v49 = vpop.f32.mrf.mxu0  ;;  %v1945_v50 = vpop.f32.mrf.mxu1 }
 0x123   :  { %v334_v51 = vpop.f32.mrf.mxu0  ;;  %v398_v52 = vpop.f32.mrf.mxu1 }
 0x125   :  { %v1930_v53 = vpop.f32.mrf.mxu0  ;;  %v1946_v54 = vpop.f32.mrf.mxu1 }
 0x126   :  { %v452_v55 = vpack.c.bf16 %v1930_v53, %v1929_v49  ;;  %v460_v56 = vpack.c.bf16 %v1946_v54, %v1945_v50 }
 0x127   :  { %v401_v57 = vpop.f32.mrf.mxu1  ;;  %v337_v58 = vpop.f32.mrf.mxu0 }
 0x128   :  { %v459_v59 = vpack.c.bf16 %v401_v57, %v398_v52  ;;  %1451 = vmatprep.subr.bf16.mxu1 %v460_v56  ;;  %v451_v60 = vpack.c.bf16 %v337_v58, %v334_v51 }
 0x129   :  { %1452 = vmatpush3.bf16.msra.mxu1 %v452_v55 }
 0x12a   :  { %1453 = vmatprep.subr.bf16.mxu1 %v459_v59 }
 0x12d   :  { %1454 = vmatpush3.bf16.msra.mxu1 %v451_v60 }
 0x12e   :  { %1455 = vmatprep.subr.bf16.mxu1 %v458_v61 }
 0x131   :  { %1456 = vmatpush3.bf16.msra.mxu1 %v450_v62 }
 0x132   :  { %1457 = vmatprep.subr.bf16.mxu1 %v457_v63 }
 0x135   :  { %1458 = vmatpush3.bf16.msra.mxu1 %v449_v0 }
 0x136   :  { %1459 = vmatprep.subr.bf16.mxu1 %v456_v1 }
 0x139   :  { %1460 = vmatpush3.bf16.msra.mxu1 %v448_v2 }
 0x13a   :  { %1461 = vmatprep.subr.bf16.mxu1 %v455_v3 }
 0x13d   :  { %1462 = vmatpush3.bf16.msra.mxu1 %v447_v4 }
 0x13e   :  { %1463 = vmatprep.subr.bf16.mxu1 %v454_v5 }
 0x141   :  { %1464 = vmatpush3.bf16.msra.mxu1 %v446_v6 }
 0x142   :  { %1465 = vmatprep.subr.bf16.mxu1 %v453_v7 }
 0x145   :  { %1466 = vmatpush3.bf16.msra.mxu1 %v445_v8 }
 0x148   :  { %654 = vmatmul.mubr.bf16.vlgmr.msra.gmra.mxu1 %v2178_v9 }
 0x149   :  { %661 = vmatprep.mubr.bf16.mxu1 %v2180_v10 }
 0x150   :  { %662 = vmatmul.mubr.bf16.gmra.mxu1 %v2184_v11 }
 0x151   :  { %669 = vmatprep.mubr.bf16.mxu1 %v2186_v12 }
 0x158   :  { %670 = vmatmul.mubr.bf16.gmra.mxu1 %v2190_v13 }
 0x159   :  { %677 = vmatprep.mubr.bf16.mxu1 %v2192_v14 }
 0x160   :  { %678 = vmatmul.mubr.bf16.gmra.mxu1 %v2196_v15 }
 0x161   :  { %685 = vmatprep.mubr.bf16.mxu1 %v2198_v16 }
 0x168   :  { %686 = vmatmul.mubr.bf16.gmra.mxu1 %v2202_v17 }
 0x169   :  { %693 = vmatprep.mubr.bf16.mxu1 %v2204_v18 }
 0x170   :  { %694 = vmatmul.mubr.bf16.gmra.mxu1 %v2208_v19 }
 0x171   :  { %701 = vmatprep.mubr.bf16.mxu1 %v2210_v20 }
 0x178   :  { %702 = vmatmul.mubr.bf16.gmra.mxu1 %v2214_v21 }
 0x179   :  { %709 = vmatprep.mubr.bf16.mxu1 %v2216_v22 }
 0x180   :  { %710 = vmatmul.mubr.bf16.gmra.mxu1 %v2220_v23 }
 0x181   :  { %717 = vmatprep.mubr.bf16.mxu1 %v2222_v25 }
 0x188   :  { %718 = vmatmul.mubr.bf16.gmra.mxu1 %v2226_v26 }
 0x189   :  { %725 = vmatprep.mubr.bf16.mxu1 %v2228_v27 }
 0x190   :  { %726 = vmatmul.mubr.bf16.gmra.mxu1 %v2232_v28 }
 0x191   :  { %733 = vmatprep.mubr.bf16.mxu1 %v2234_v29 }
 0x198   :  { %734 = vmatmul.mubr.bf16.gmra.mxu1 %v2238_v30 }
 0x199   :  { %741 = vmatprep.mubr.bf16.mxu1 %v2240_v31 }
 0x1a0   :  { %742 = vmatmul.mubr.bf16.gmra.mxu1 %v2244_v32 }
 0x1a1   :  { %749 = vmatprep.mubr.bf16.mxu1 %v2246_v33 }
 0x1a8   :  { %750 = vmatmul.mubr.bf16.gmra.mxu1 %v2250_v34 }
 0x1a9   :  { %757 = vmatprep.mubr.bf16.mxu1 %v2252_v35 }
 0x1b0   :  { %758 = vmatmul.mubr.bf16.gmra.mxu1 %v2256_v36 }
 0x1b1   :  { %765 = vmatprep.mubr.bf16.mxu1 %v2258_v37 }
 0x1b8   :  { %766 = vmatmul.mubr.bf16.gmra.mxu1 %v2262_v38 }
 0x1b9   :  { %773 = vmatprep.mubr.bf16.mxu1 %v2264_v39 }
 0x1c0   :  { %774 = vmatmul.mubr.bf16.gmra.mxu1 %v2268_v40 }
 0x1c1   :  { %1007 = vmatprep.mubr.bf16.mxu1 %v2174_v24 }
 0x208   :  { %v1467_v41 = vpop.f32.mrf.mxu1 }
 0x20a   :  { %v1468_v42 = vpop.f32.mrf.mxu1 }
 0x20b   :  { %v2272_v43 = vadd.f32 %v1468_v42, %v1467_v41 }
 0x20c   :  { %v1470_v44 = vpop.f32.mrf.mxu1 }
 0x20e   :  { %v1471_v45 = vpop.f32.mrf.mxu1 }
 0x20f   :  { %v2274_v46 = vadd.f32 %v1471_v45, %v1470_v44 }
 0x210   :  { %v1473_v47 = vpop.f32.mrf.mxu1 }
 0x212   :  { %v1474_v49 = vpop.f32.mrf.mxu1 }
 0x213   :  { %v2278_v50 = vadd.f32 %v1474_v49, %v1473_v47 }
 0x214   :  { %v1476_v51 = vpop.f32.mrf.mxu1 }
 0x216   :  { %v1477_v52 = vpop.f32.mrf.mxu1 }
 0x217   :  { %v2280_v53 = vadd.f32 %v1477_v52, %v1476_v51 }
 0x218   :  { %v1479_v54 = vpop.f32.mrf.mxu1 }
 0x21a   :  { %v1480_v56 = vpop.f32.mrf.mxu1 }
 0x21b   :  { %v2284_v57 = vadd.f32 %v1480_v56, %v1479_v54 }
 0x21c   :  { %v1482_v58 = vpop.f32.mrf.mxu1 }
 0x21e   :  { %v1483_v59 = vpop.f32.mrf.mxu1 }
 0x21f   :  { %v2286_v60 = vadd.f32 %v1483_v59, %v1482_v58 }
 0x220   :  { %v1485_v61 = vpop.f32.mrf.mxu1 }
 0x222   :  { %v1486_v63 = vpop.f32.mrf.mxu1 }
 0x223   :  { %v2290_v0 = vadd.f32 %v1486_v63, %v1485_v61 }
 0x224   :  { %v1488_v1 = vpop.f32.mrf.mxu1 }
 0x226   :  { %v1489_v2 = vpop.f32.mrf.mxu1 }
 0x227   :  { %v2292_v3 = vadd.f32 %v1489_v2, %v1488_v1 }
 0x228   :  { %v1491_v4 = vpop.f32.mrf.mxu1 }
 0x22a   :  { %v1492_v6 = vpop.f32.mrf.mxu1 }
 0x22b   :  { %v2296_v7 = vadd.f32 %v1492_v6, %v1491_v4 }
 0x22c   :  { %v1494_v8 = vpop.f32.mrf.mxu1 }
 0x22e   :  { %v1495_v41 = vpop.f32.mrf.mxu1 }
 0x22f   :  { %v2298_v42 = vadd.f32 %v1495_v41, %v1494_v8 }
 0x230   :  { %v1497_v44 = vpop.f32.mrf.mxu1 }
 0x232   :  { %v1498_v47 = vpop.f32.mrf.mxu1 }
 0x233   :  { %v2302_v49 = vadd.f32 %v1498_v47, %v1497_v44 }
 0x234   :  { %v1500_v51 = vpop.f32.mrf.mxu1 }
 0x236   :  { %v1501_v52 = vpop.f32.mrf.mxu1 }
 0x237   :  { %v2304_v54 = vadd.f32 %v1501_v52, %v1500_v51 }
 0x238   :  { %v1503_v56 = vpop.f32.mrf.mxu1 }
 0x23a   :  { %v1504_v59 = vpop.f32.mrf.mxu1 }
 0x23b   :  { %v2308_v61 = vadd.f32 %v1504_v59, %v1503_v56 }
 0x23c   :  { %v1506_v63 = vpop.f32.mrf.mxu1 }
 0x23e   :  { %v1507_v1 = vpop.f32.mrf.mxu1 }
 0x23f   :  { %v1508_v2 = vadd.f32 %v1507_v1, %v1506_v63 }
 0x240   :  { %v1509_v4 = vpop.f32.mrf.mxu1 }
 0x241   :  { %v788_v6 = vpack.c.bf16 %v1508_v2, %v2308_v61 }
 0x242   :  { %v1510_v8 = vpop.f32.mrf.mxu1 }
 0x243   :  { %v1511_v41 = vadd.f32 %v1510_v8, %v1509_v4 }
 0x244   :  { %v1512_v44 = vpop.f32.mrf.mxu1 }
 0x246   :  { %v1513_v47 = vpop.f32.mrf.mxu1 }
 0x247   :  { %v1514_v48 = vadd.f32 %v1513_v47, %v1512_v44 }
 0x248   :  { %v1515_v51 = vpop.f32.mrf.mxu1 }
 0x249   :  { %v789_v52 = vpack.c.bf16 %v1514_v48, %v1511_v41 }
 0x24a   :  { %v1516_v55 = vpop.f32.mrf.mxu1 }
 0x24b   :  { %v2311_v62 = vadd.f32 %v1516_v55, %v1515_v51 }
 0x24c   :  { %v1518_v5 = vpop.f32.mrf.mxu1 }
 0x24e   :  { %v1519_v45 = vpop.f32.mrf.mxu1 }
 0x24f   :  { %v2313_v56 = vadd.f32 %v1519_v45, %v1518_v5 }
 0x250   :  { %v1521_v59 = vpop.f32.mrf.mxu1 }
 0x251   :  { %v790_v63 = vpack.c.bf16 %v2313_v56, %v2311_v62 }
 0x252   :  { %v1522_v1 = vpop.f32.mrf.mxu1 }
 0x253   :  { %v1523_v61 = vadd.f32 %v1522_v1, %v1521_v59 }
 0x254   :  { %v1524_v2 = vpop.f32.mrf.mxu1 }
 0x256   :  { %v1525_v4 = vpop.f32.mrf.mxu1 }
 0x257   :  { %v1526_v8 = vadd.f32 %v1525_v4, %v1524_v2 }
 0x258   :  { %v1527_v58 = vpop.f32.mrf.mxu1 }
 0x259   :  { %v791_v44 = vpack.c.bf16 %v1526_v8, %v1523_v61 }
 0x25a   :  { %v1528_v47 = vpop.f32.mrf.mxu1 }
 0x25c   :  { %v1530_v48 = vpop.f32.mrf.mxu1 }
 0x25e   :  { %v1531_v41 = vpop.f32.mrf.mxu1 }
 0x260   :  { %v1533_v55 = vpop.f32.mrf.mxu1 }
 0x262   :  { %v1534_v51 = vpop.f32.mrf.mxu1 }
 0x264   :  { %v1536_v24 = vpop.f32.mrf.mxu1 }
 0x266   :  { %v1537_v40 = vpop.f32.mrf.mxu1 }
 0x267   :  { %v1538_v21 = vadd.f32 %v1537_v40, %v1536_v24  ;;  %v2668_v24 = vpack.c.bf16 %v2286_v60, %v2284_v57  ;;  %v2681_v40 = vld [vmem:[#allocation23_spill] sm:$0xff]  ;;  %v2686_v57 = vld [vmem:[#allocation28_spill] sm:$0xff]  ;;  %v2687_v60 = vld [vmem:[#allocation29_spill] sm:$0xff] }
 0x268   :  { %v1539_v5 = vpop.f32.mrf.mxu1 }
 0x26a   :  { %v1540_v45 = vpop.f32.mrf.mxu1 }
 0x26b   :  { %v1541_v22 = vadd.f32 %v1540_v45, %v1539_v5 }
 0x26c   :  { %v1542_v39 = vpop.f32.mrf.mxu1 }
 0x26e   :  { %v1543_v38 = vpop.f32.mrf.mxu1 }
 0x26f   :  { %v1544_v25 = vadd.f32 %v1543_v38, %v1542_v39  ;;  %v2679_v38 = vld [vmem:[#allocation21_spill] sm:$0xff]  ;;  %v2680_v39 = vld [vmem:[#allocation22_spill] sm:$0xff] }
 0x270   :  { %v1545_v37 = vpop.f32.mrf.mxu1 }
 0x271   :  { %v794_v20 = vpack.c.bf16 %v1544_v25, %v1541_v22  ;;  %v2671_v22 = vld [vmem:[#allocation13_spill] sm:$0xff]  ;;  %v2672_v25 = vld [vmem:[#allocation14_spill] sm:$0xff] }
 0x272   :  { %v1546_v62 = vpop.f32.mrf.mxu1 }
 0x273   :  { %v1547_v26 = vadd.f32 %v1546_v62, %v1545_v37  ;;  %v2678_v37 = vld [vmem:[#allocation20_spill] sm:$0xff] }
 0x274   :  { %v1548_v56 = vpop.f32.mrf.mxu1 }
 0x276   :  { %v1549_v59 = vpop.f32.mrf.mxu1 }
 0x277   :  { %v1550_v28 = vadd.f32 %v1549_v59, %v1548_v56 }
 0x278   :  { %v1551_v1 = vpop.f32.mrf.mxu1 }
 0x279   :  { %v795_v23 = vpack.c.bf16 %v1550_v28, %v1547_v26  ;;  %v2673_v28 = vld [vmem:[#allocation15_spill] sm:$0xff] }
 0x27a   :  { %v1552_v36 = vpop.f32.mrf.mxu1 }
 0x27b   :  { %v1553_v30 = vadd.f32 %v1552_v36, %v1551_v1  ;;  %v2677_v36 = vld [vmem:[#allocation19_spill] sm:$0xff] }
 0x27c   :  { %v1554_v2 = vpop.f32.mrf.mxu1 }
 0x27e   :  { %v1555_v4 = vpop.f32.mrf.mxu1 }
 0x27f   :  { %v1556_v33 = vadd.f32 %v1555_v4, %v1554_v2  ;;  %v2665_v2 = vpack.c.bf16 %v2304_v54, %v2302_v49 }
 0x280   :  { %v1557_v61 = vpop.f32.mrf.mxu1 }
 0x281   :  { %v796_v27 = vpack.c.bf16 %v1556_v33, %v1553_v30  ;;  %v2674_v30 = vld [vmem:[#allocation16_spill] sm:$0xff]  ;;  %v2675_v33 = vld [vmem:[#allocation17_spill] sm:$0xff] }
 0x282   :  { %v1558_v8 = vpop.f32.mrf.mxu1 }
 0x283   :  { %v1559_v32 = vadd.f32 %v1558_v8, %v1557_v61 }
 0x284   :  { %v1560_v35 = vpop.f32.mrf.mxu1 }
 0x286   :  { %v1561_v34 = vpop.f32.mrf.mxu1 }
 0x287   :  { %v1562_v31 = vadd.f32 %v1561_v34, %v1560_v35  ;;  %v1535_v34 = vadd.f32 %v1534_v51, %v1533_v55  ;;  %v2676_v35 = vld [vmem:[#allocation18_spill] sm:$0xff] }
 0x289   :  { %v797_v29 = vpack.c.bf16 %v1562_v31, %v1559_v32  ;;  %v1532_v31 = vadd.f32 %v1531_v41, %v1530_v48  ;;  %v793_v32 = vpack.c.bf16 %v1538_v21, %v1535_v34  ;;  %v2670_v21 = vpack.c.bf16 %v2274_v46, %v2272_v43  ;;  %v2682_v43 = vld [vmem:[#allocation24_spill] sm:$0xff]  ;;  %v2683_v46 = vld [vmem:[#allocation25_spill] sm:$0xff] }
 0x28b   :  { %1563 = vmatprep.subr.bf16.mxu0 %v797_v29  ;;  %v2666_v29 = vpack.c.bf16 %v2298_v42, %v2296_v7  ;;  %v2690_v7 = vld [vmem:[#allocation32_spill] sm:$0xff] }
 0x28c   :  { %1564 = vmatpush3.bf16.msra.mxu0 %v789_v52  ;;  %v2691_v42 = vld [vmem:[#allocation12_spill] sm:$0xff] }
 0x28d   :  { %1565 = vmatprep.subr.bf16.mxu0 %v796_v27  ;;  %v1529_v27 = vadd.f32 %v1528_v47, %v1527_v58 }
 0x28f   :  { %v792_v26 = vpack.c.bf16 %v1532_v31, %v1529_v27 }
 0x290   :  { %1566 = vmatpush3.bf16.msra.mxu0 %v788_v6 }
 0x291   :  { %1567 = vmatprep.subr.bf16.mxu0 %v795_v23  ;;  %v2667_v23 = vpack.c.bf16 %v2292_v3, %v2290_v0  ;;  %v2688_v0 = vld [vmem:[#allocation30_spill] sm:$0xff]  ;;  %v2689_v3 = vld [vmem:[#allocation31_spill] sm:$0xff] }
 0x294   :  { %1568 = vmatpush3.bf16.msra.mxu0 %v2665_v2 }
 0x295   :  { %1569 = vmatprep.subr.bf16.mxu0 %v794_v20  ;;  %v2669_v20 = vpack.c.bf16 %v2280_v53, %v2278_v50  ;;  %v2684_v50 = vld [vmem:[#allocation26_spill] sm:$0xff]  ;;  %v2685_v53 = vld [vmem:[#allocation27_spill] sm:$0xff] }
 0x298   :  { %1570 = vmatpush3.bf16.msra.mxu0 %v2666_v29 }
 0x299   :  { %1571 = vmatprep.subr.bf16.mxu0 %v793_v32 }
 0x29c   :  { %1572 = vmatpush3.bf16.msra.mxu0 %v2667_v23 }
 0x29d   :  { %1573 = vmatprep.subr.bf16.mxu0 %v792_v26 }
 0x2a0   :  { %1574 = vmatpush3.bf16.msra.mxu0 %v2668_v24 }
 0x2a1   :  { %1575 = vmatprep.subr.bf16.mxu0 %v791_v44 }
 0x2a4   :  { %1576 = vmatpush3.bf16.msra.mxu0 %v2669_v20 }
 0x2a5   :  { %1577 = vmatprep.subr.bf16.mxu0 %v790_v63 }
 0x2a8   :  { %1578 = vmatpush3.bf16.msra.mxu0 %v2670_v21 }
 0x2ab   :  { %831 = vmatmul.mubr.bf16.vlgmr.msra.gmra.mxu0 %v2178_v9 }
 0x2ac   :  { %838 = vmatprep.mubr.bf16.mxu0 %v2180_v10 }
 0x2b3   :  { %839 = vmatmul.mubr.bf16.gmra.mxu0 %v2184_v11 }
 0x2b4   :  { %846 = vmatprep.mubr.bf16.mxu0 %v2186_v12 }
 0x2bb   :  { %847 = vmatmul.mubr.bf16.gmra.mxu0 %v2190_v13 }
 0x2bc   :  { %854 = vmatprep.mubr.bf16.mxu0 %v2192_v14 }
 0x2c3   :  { %855 = vmatmul.mubr.bf16.gmra.mxu0 %v2196_v15 }
 0x2c4   :  { %862 = vmatprep.mubr.bf16.mxu0 %v2198_v16 }
 0x2cb   :  { %863 = vmatmul.mubr.bf16.gmra.mxu0 %v2202_v17 }
 0x2cc   :  { %870 = vmatprep.mubr.bf16.mxu0 %v2204_v18 }
 0x2d3   :  { %871 = vmatmul.mubr.bf16.gmra.mxu0 %v2208_v19 }
 0x2d4   :  { %878 = vmatprep.mubr.bf16.mxu0 %v2671_v22 }
 0x2db   :  { %879 = vmatmul.mubr.bf16.gmra.mxu0 %v2672_v25 }
 0x2dc   :  { %886 = vmatprep.mubr.bf16.mxu0 %v2673_v28 }
 0x2e3   :  { %887 = vmatmul.mubr.bf16.gmra.mxu0 %v2674_v30 }
 0x2e4   :  { %894 = vmatprep.mubr.bf16.mxu0 %v2675_v33 }
 0x2eb   :  { %895 = vmatmul.mubr.bf16.gmra.mxu0 %v2676_v35 }
 0x2ec   :  { %902 = vmatprep.mubr.bf16.mxu0 %v2677_v36 }
 0x2f3   :  { %903 = vmatmul.mubr.bf16.gmra.mxu0 %v2678_v37 }
 0x2f4   :  { %910 = vmatprep.mubr.bf16.mxu0 %v2679_v38 }
 0x2fb   :  { %911 = vmatmul.mubr.bf16.gmra.mxu0 %v2680_v39 }
 0x2fc   :  { %918 = vmatprep.mubr.bf16.mxu0 %v2681_v40 }
 0x303   :  { %919 = vmatmul.mubr.bf16.gmra.mxu0 %v2682_v43 }
 0x304   :  { %926 = vmatprep.mubr.bf16.mxu0 %v2683_v46 }
 0x30b   :  { %927 = vmatmul.mubr.bf16.gmra.mxu0 %v2684_v50 }
 0x30c   :  { %934 = vmatprep.mubr.bf16.mxu0 %v2685_v53 }
 0x313   :  { %935 = vmatmul.mubr.bf16.gmra.mxu0 %v2686_v57 }
 0x314   :  { %942 = vmatprep.mubr.bf16.mxu0 %v2687_v60 }
 0x31b   :  { %943 = vmatmul.mubr.bf16.gmra.mxu0 %v2688_v0 }
 0x31c   :  { %950 = vmatprep.mubr.bf16.mxu0 %v2689_v3 }
 0x323   :  { %951 = vmatmul.mubr.bf16.gmra.mxu0 %v2690_v7 }
 0x324   :  { %1191 = vmatprep.mubr.bf16.mxu0 %v2691_v42 }
 0x36b   :  { %v1579_v49 = vpop.f32.mrf.mxu0 }
 0x36d   :  { %v1580_v54 = vpop.f32.mrf.mxu0 }
 0x36e   :  { %v2367_v58 = vadd.f32 %v1580_v54, %v1579_v49 }
 0x36f   :  { %v1582_v6 = vpop.f32.mrf.mxu0 }
 0x371   :  { %v1583_v52 = vpop.f32.mrf.mxu0 }
 0x372   :  { %v2369_v63 = vadd.f32 %v1583_v52, %v1582_v6 }
 0x373   :  { %v1585_v44 = vpop.f32.mrf.mxu0 }
 0x375   :  { %v1586_v48 = vpop.f32.mrf.mxu0 }
 0x376   :  { %v2373_v41 = vadd.f32 %v1586_v48, %v1585_v44 }
 0x377   :  { %v1588_v55 = vpop.f32.mrf.mxu0 }
 0x379   :  { %v1589_v51 = vpop.f32.mrf.mxu0 }
 0x37a   :  { %v2375_v5 = vadd.f32 %v1589_v51, %v1588_v55 }
 0x37b   :  { %v1591_v45 = vpop.f32.mrf.mxu0 }
 0x37d   :  { %v1592_v56 = vpop.f32.mrf.mxu0 }
 0x37e   :  { %v2379_v59 = vadd.f32 %v1592_v56, %v1591_v45 }
 0x37f   :  { %v1594_v1 = vpop.f32.mrf.mxu0 }
 0x381   :  { %v1595_v4 = vpop.f32.mrf.mxu0 }
 0x382   :  { %v2381_v61 = vadd.f32 %v1595_v4, %v1594_v1 }
 0x383   :  { %v1597_v8 = vpop.f32.mrf.mxu0 }
 0x385   :  { %v1598_v34 = vpop.f32.mrf.mxu0 }
 0x386   :  { %v2385_v31 = vadd.f32 %v1598_v34, %v1597_v8 }
 0x387   :  { %v1600_v32 = vpop.f32.mrf.mxu0 }
 0x389   :  { %v1601_v29 = vpop.f32.mrf.mxu0 }
 0x38a   :  { %v2387_v27 = vadd.f32 %v1601_v29, %v1600_v32 }
 0x38b   :  { %v1603_v26 = vpop.f32.mrf.mxu0 }
 0x38d   :  { %v1604_v24 = vpop.f32.mrf.mxu0 }
 0x38e   :  { %v2391_v20 = vadd.f32 %v1604_v24, %v1603_v26 }
 0x38f   :  { %v1606_v21 = vpop.f32.mrf.mxu0 }
 0x391   :  { %v1607_v42 = vpop.f32.mrf.mxu0 }
 0x392   :  { %v2393_v49 = vadd.f32 %v1607_v42, %v1606_v21 }
 0x393   :  { %v1609_v54 = vpop.f32.mrf.mxu0 }
 0x395   :  { %v1610_v52 = vpop.f32.mrf.mxu0 }
 0x396   :  { %v2397_v44 = vadd.f32 %v1610_v52, %v1609_v54 }
 0x397   :  { %v1612_v48 = vpop.f32.mrf.mxu0 }
 0x399   :  { %v1613_v55 = vpop.f32.mrf.mxu0 }
 0x39a   :  { %v2399_v51 = vadd.f32 %v1613_v55, %v1612_v48 }
 0x39b   :  { %v1615_v45 = vpop.f32.mrf.mxu0 }
 0x39d   :  { %v1616_v1 = vpop.f32.mrf.mxu0 }
 0x39e   :  { %v2403_v4 = vadd.f32 %v1616_v1, %v1615_v45 }
 0x39f   :  { %v1618_v8 = vpop.f32.mrf.mxu0 }
 0x3a1   :  { %v1619_v34 = vpop.f32.mrf.mxu0 }
 0x3a2   :  { %v1620_v32 = vadd.f32 %v1619_v34, %v1618_v8 }
 0x3a3   :  { %v1621_v29 = vpop.f32.mrf.mxu0 }
 0x3a4   :  { %v965_v26 = vpack.c.bf16 %v1620_v32, %v2403_v4 }
 0x3a5   :  { %v1622_v24 = vpop.f32.mrf.mxu0 }
 0x3a6   :  { %v1623_v21 = vadd.f32 %v1622_v24, %v1621_v29 }
 0x3a7   :  { %v1624_v42 = vpop.f32.mrf.mxu0 }
 0x3a9   :  { %v1625_v54 = vpop.f32.mrf.mxu0 }
 0x3aa   :  { %v1626_v52 = vadd.f32 %v1625_v54, %v1624_v42 }
 0x3ab   :  { %v1627_v48 = vpop.f32.mrf.mxu0 }
 0x3ac   :  { %v966_v55 = vpack.c.bf16 %v1626_v52, %v1623_v21 }
 0x3ad   :  { %v1628_v47 = vpop.f32.mrf.mxu0 }
 0x3ae   :  { %v2406_v62 = vadd.f32 %v1628_v47, %v1627_v48 }
 0x3af   :  { %v1630_v2 = vpop.f32.mrf.mxu0 }
 0x3b1   :  { %v1631_v23 = vpop.f32.mrf.mxu0 }
 0x3b2   :  { %v2408_v45 = vadd.f32 %v1631_v23, %v1630_v2 }
 0x3b3   :  { %v1633_v1 = vpop.f32.mrf.mxu0 }
 0x3b4   :  { %v967_v8 = vpack.c.bf16 %v2408_v45, %v2406_v62 }
 0x3b5   :  { %v1634_v34 = vpop.f32.mrf.mxu0 }
 0x3b6   :  { %v1635_v4 = vadd.f32 %v1634_v34, %v1633_v1 }
 0x3b7   :  { %v1636_v32 = vpop.f32.mrf.mxu0 }
 0x3b9   :  { %v1637_v29 = vpop.f32.mrf.mxu0 }
 0x3ba   :  { %v1638_v24 = vadd.f32 %v1637_v29, %v1636_v32 }
 0x3bb   :  { %v1639_v6 = vpop.f32.mrf.mxu0 }
 0x3bc   :  { %v968_v42 = vpack.c.bf16 %v1638_v24, %v1635_v4 }
 0x3bd   :  { %v1640_v54 = vpop.f32.mrf.mxu0 }
 0x3bf   :  { %v1642_v21 = vpop.f32.mrf.mxu0 }
 0x3c1   :  { %v1643_v52 = vpop.f32.mrf.mxu0 }
 0x3c3   :  { %v1645_v47 = vpop.f32.mrf.mxu0 }
 0x3c5   :  { %v1646_v48 = vpop.f32.mrf.mxu0 }
 0x3c7   :  { %v1648_v56 = vpop.f32.mrf.mxu0 }
 0x3c9   :  { %v1649_v7 = vpop.f32.mrf.mxu0 }
 0x3ca   :  { %v1650_v25 = vadd.f32 %v1649_v7, %v1648_v56  ;;  %v2707_v7 = vld [vmem:[#allocation22_spill] sm:$0xff] }
 0x3cb   :  { %v1651_v2 = vpop.f32.mrf.mxu0 }
 0x3cd   :  { %v1652_v23 = vpop.f32.mrf.mxu0 }
 0x3ce   :  { %v1653_v28 = vadd.f32 %v1652_v23, %v1651_v2 }
 0x3cf   :  { %v1654_v3 = vpop.f32.mrf.mxu0 }
 0x3d1   :  { %v1655_v0 = vpop.f32.mrf.mxu0 }
 0x3d2   :  { %v1656_v33 = vadd.f32 %v1655_v0, %v1654_v3  ;;  %v2705_v0 = vld [vmem:[#allocation20_spill] sm:$0xff]  ;;  %v2706_v3 = vld [vmem:[#allocation21_spill] sm:$0xff] }
 0x3d3   :  { %v1657_v60 = vpop.f32.mrf.mxu0 }
 0x3d4   :  { %v971_v22 = vpack.c.bf16 %v1656_v33, %v1653_v28  ;;  %v2695_v28 = vpack.c.bf16 %v2381_v61, %v2379_v59  ;;  %v2698_v33 = vld [vmem:[#allocation13_spill] sm:$0xff]  ;;  %v2712_v59 = vld [vmem:[#allocation27_spill] sm:$0xff]  ;;  %v2713_v61 = vld [vmem:[#allocation28_spill] sm:$0xff] }
 0x3d5   :  { %v1658_v62 = vpop.f32.mrf.mxu0 }
 0x3d6   :  { %v1659_v35 = vadd.f32 %v1658_v62, %v1657_v60  ;;  %v2704_v60 = vld [vmem:[#allocation19_spill] sm:$0xff] }
 0x3d7   :  { %v1660_v45 = vpop.f32.mrf.mxu0 }
 0x3d9   :  { %v1661_v1 = vpop.f32.mrf.mxu0 }
 0x3da   :  { %v1662_v37 = vadd.f32 %v1661_v1, %v1660_v45 }
 0x3db   :  { %v1663_v34 = vpop.f32.mrf.mxu0 }
 0x3dc   :  { %v972_v30 = vpack.c.bf16 %v1662_v37, %v1659_v35  ;;  %v2699_v37 = vld [vmem:[#allocation14_spill] sm:$0xff] }
 0x3dd   :  { %v1664_v57 = vpop.f32.mrf.mxu0 }
 0x3de   :  { %v1665_v39 = vadd.f32 %v1664_v57, %v1663_v34  ;;  %v2703_v57 = vld [vmem:[#allocation18_spill] sm:$0xff] }
 0x3df   :  { %v1666_v32 = vpop.f32.mrf.mxu0 }
 0x3e1   :  { %v1667_v29 = vpop.f32.mrf.mxu0 }
 0x3e2   :  { %v1668_v46 = vadd.f32 %v1667_v29, %v1666_v32  ;;  %v2692_v32 = vpack.c.bf16 %v2399_v51, %v2397_v44 }
 0x3e3   :  { %v1669_v4 = vpop.f32.mrf.mxu0 }
 0x3e4   :  { %v973_v36 = vpack.c.bf16 %v1668_v46, %v1665_v39  ;;  %v2700_v39 = vld [vmem:[#allocation15_spill] sm:$0xff]  ;;  %v2701_v46 = vld [vmem:[#allocation16_spill] sm:$0xff] }
 0x3e5   :  { %v1670_v24 = vpop.f32.mrf.mxu0 }
 0x3e6   :  { %v1671_v43 = vadd.f32 %v1670_v24, %v1669_v4 }
 0x3e7   :  { %v1672_v53 = vpop.f32.mrf.mxu0 }
 0x3e9   :  { %v1673_v50 = vpop.f32.mrf.mxu0 }
 0x3ea   :  { %v1674_v40 = vadd.f32 %v1673_v50, %v1672_v53  ;;  %v1647_v50 = vadd.f32 %v1646_v48, %v1645_v47  ;;  %v2702_v53 = vld [vmem:[#allocation17_spill] sm:$0xff] }
 0x3ec   :  { %v974_v38 = vpack.c.bf16 %v1674_v40, %v1671_v43  ;;  %v1644_v40 = vadd.f32 %v1643_v52, %v1642_v21  ;;  %v970_v43 = vpack.c.bf16 %v1650_v25, %v1647_v50  ;;  %v2697_v25 = vpack.c.bf16 %v2369_v63, %v2367_v58  ;;  %v2708_v58 = vld [vmem:[#allocation23_spill] sm:$0xff]  ;;  %v2709_v63 = vld [vmem:[#allocation24_spill] sm:$0xff] }
 0x3ee   :  { %1675 = vmatprep.subr.bf16.mxu1 %v974_v38  ;;  %v2693_v38 = vpack.c.bf16 %v2393_v49, %v2391_v20  ;;  %v2716_v20 = vld [vmem:[#allocation31_spill] sm:$0xff]  ;;  %v2717_v49 = vld [vmem:[#allocation32_spill] sm:$0xff] }
 0x3ef   :  { %1676 = vmatpush3.bf16.msra.mxu1 %v966_v55 }
 0x3f0   :  { %1677 = vmatprep.subr.bf16.mxu1 %v973_v36  ;;  %v1641_v36 = vadd.f32 %v1640_v54, %v1639_v6 }
 0x3f2   :  { %v969_v35 = vpack.c.bf16 %v1644_v40, %v1641_v36 }
 0x3f3   :  { %1678 = vmatpush3.bf16.msra.mxu1 %v965_v26 }
 0x3f4   :  { %1679 = vmatprep.subr.bf16.mxu1 %v972_v30  ;;  %v2694_v30 = vpack.c.bf16 %v2387_v27, %v2385_v31  ;;  %v2714_v31 = vld [vmem:[#allocation29_spill] sm:$0xff]  ;;  %v2715_v27 = vld [vmem:[#allocation30_spill] sm:$0xff] }
 0x3f7   :  { %1680 = vmatpush3.bf16.msra.mxu1 %v2692_v32 }
 0x3f8   :  { %1681 = vmatprep.subr.bf16.mxu1 %v971_v22  ;;  %v2696_v22 = vpack.c.bf16 %v2375_v5, %v2373_v41  ;;  %v2710_v41 = vld [vmem:[#allocation25_spill] sm:$0xff]  ;;  %v2711_v5 = vld [vmem:[#allocation26_spill] sm:$0xff] }
 0x3fb   :  { %1682 = vmatpush3.bf16.msra.mxu1 %v2693_v38 }
 0x3fc   :  { %1683 = vmatprep.subr.bf16.mxu1 %v970_v43 }
 0x3ff   :  { %1684 = vmatpush3.bf16.msra.mxu1 %v2694_v30 }
 0x400   :  { %1685 = vmatprep.subr.bf16.mxu1 %v969_v35 }
 0x403   :  { %1686 = vmatpush3.bf16.msra.mxu1 %v2695_v28 }
 0x404   :  { %1687 = vmatprep.subr.bf16.mxu1 %v968_v42 }
 0x407   :  { %1688 = vmatpush3.bf16.msra.mxu1 %v2696_v22 }
 0x408   :  { %1689 = vmatprep.subr.bf16.mxu1 %v967_v8 }
 0x40b   :  { %1690 = vmatpush3.bf16.msra.mxu1 %v2697_v25 }
 0x40e   :  { %1008 = vmatmul.mubr.bf16.vlgmr.msra.gmra.mxu1 %v2178_v9 }
 0x40f   :  { %1015 = vmatprep.mubr.bf16.mxu1 %v2180_v10 }
 0x416   :  { %1016 = vmatmul.mubr.bf16.gmra.mxu1 %v2184_v11 }
 0x417   :  { %1023 = vmatprep.mubr.bf16.mxu1 %v2186_v12 }
 0x41e   :  { %1024 = vmatmul.mubr.bf16.gmra.mxu1 %v2190_v13 }
 0x41f   :  { %1031 = vmatprep.mubr.bf16.mxu1 %v2192_v14 }
 0x426   :  { %1032 = vmatmul.mubr.bf16.gmra.mxu1 %v2196_v15 }
 0x427   :  { %1039 = vmatprep.mubr.bf16.mxu1 %v2198_v16 }
 0x42e   :  { %1040 = vmatmul.mubr.bf16.gmra.mxu1 %v2202_v17 }
 0x42f   :  { %1047 = vmatprep.mubr.bf16.mxu1 %v2204_v18 }
 0x436   :  { %1048 = vmatmul.mubr.bf16.gmra.mxu1 %v2208_v19 }
 0x437   :  { %1055 = vmatprep.mubr.bf16.mxu1 %v2698_v33 }
 0x43e   :  { %1056 = vmatmul.mubr.bf16.gmra.mxu1 %v2699_v37 }
 0x43f   :  { %1063 = vmatprep.mubr.bf16.mxu1 %v2700_v39 }
 0x446   :  { %1064 = vmatmul.mubr.bf16.gmra.mxu1 %v2701_v46 }
 0x447   :  { %1071 = vmatprep.mubr.bf16.mxu1 %v2702_v53 }
 0x44e   :  { %1072 = vmatmul.mubr.bf16.gmra.mxu1 %v2703_v57 }
 0x44f   :  { %1079 = vmatprep.mubr.bf16.mxu1 %v2704_v60 }
 0x456   :  { %1080 = vmatmul.mubr.bf16.gmra.mxu1 %v2705_v0 }
 0x457   :  { %1087 = vmatprep.mubr.bf16.mxu1 %v2706_v3 }
 0x45e   :  { %1088 = vmatmul.mubr.bf16.gmra.mxu1 %v2707_v7 }
 0x45f   :  { %1095 = vmatprep.mubr.bf16.mxu1 %v2708_v58 }
 0x466   :  { %1096 = vmatmul.mubr.bf16.gmra.mxu1 %v2709_v63 }
 0x467   :  { %1103 = vmatprep.mubr.bf16.mxu1 %v2710_v41 }
 0x46e   :  { %1104 = vmatmul.mubr.bf16.gmra.mxu1 %v2711_v5 }
 0x46f   :  { %1111 = vmatprep.mubr.bf16.mxu1 %v2712_v59 }
 0x476   :  { %1112 = vmatmul.mubr.bf16.gmra.mxu1 %v2713_v61 }
 0x477   :  { %1119 = vmatprep.mubr.bf16.mxu1 %v2714_v31 }
 0x47e   :  { %1120 = vmatmul.mubr.bf16.gmra.mxu1 %v2715_v27 }
 0x47f   :  { %1127 = vmatprep.mubr.bf16.mxu1 %v2716_v20 }
 0x486   :  { %1128 = vmatmul.mubr.bf16.gmra.mxu1 %v2717_v49 }
 0x4ce   :  { %v1691_v6 = vpop.f32.mrf.mxu1 }
 0x4d0   :  { %v1692_v44 = vpop.f32.mrf.mxu1 }
 0x4d1   :  { %v2461_v51 = vadd.f32 %v1692_v44, %v1691_v6 }
 0x4d2   :  { %v1694_v56 = vpop.f32.mrf.mxu1 }
 0x4d4   :  { %v1695_v26 = vpop.f32.mrf.mxu1 }
 0x4d5   :  { %v2463_v55 = vadd.f32 %v1695_v26, %v1694_v56 }
 0x4d6   :  { %v1697_v8 = vpop.f32.mrf.mxu1 }
 0x4d8   :  { %v1698_v54 = vpop.f32.mrf.mxu1 }
 0x4d9   :  { %v2467_v21 = vadd.f32 %v1698_v54, %v1697_v8 }
 0x4da   :  { %v1700_v52 = vpop.f32.mrf.mxu1 }
 0x4dc   :  { %v1701_v47 = vpop.f32.mrf.mxu1 }
 0x4dd   :  { %v2469_v48 = vadd.f32 %v1701_v47, %v1700_v52 }
 0x4de   :  { %v1703_v2 = vpop.f32.mrf.mxu1 }
 0x4e0   :  { %v1704_v62 = vpop.f32.mrf.mxu1 }
 0x4e1   :  { %v2473_v45 = vadd.f32 %v1704_v62, %v1703_v2 }
 0x4e2   :  { %v1706_v1 = vpop.f32.mrf.mxu1 }
 0x4e4   :  { %v1707_v34 = vpop.f32.mrf.mxu1 }
 0x4e5   :  { %v2475_v29 = vadd.f32 %v1707_v34, %v1706_v1 }
 0x4e6   :  { %v1709_v4 = vpop.f32.mrf.mxu1 }
 0x4e8   :  { %v1710_v32 = vpop.f32.mrf.mxu1 }
 0x4e9   :  { %v2479_v50 = vadd.f32 %v1710_v32, %v1709_v4 }
 0x4ea   :  { %v1712_v40 = vpop.f32.mrf.mxu1 }
 0x4ec   :  { %v1713_v43 = vpop.f32.mrf.mxu1 }
 0x4ed   :  { %v2481_v38 = vadd.f32 %v1713_v43, %v1712_v40 }
 0x4ee   :  { %v1715_v36 = vpop.f32.mrf.mxu1 }
 0x4f0   :  { %v1716_v30 = vpop.f32.mrf.mxu1 }
 0x4f1   :  { %v2485_v28 = vadd.f32 %v1716_v30, %v1715_v36 }
 0x4f2   :  { %v1718_v22 = vpop.f32.mrf.mxu1 }
 0x4f4   :  { %v1719_v25 = vpop.f32.mrf.mxu1 }
 0x4f5   :  { %v2487_v6 = vadd.f32 %v1719_v25, %v1718_v22 }
 0x4f6   :  { %v1721_v44 = vpop.f32.mrf.mxu1 }
 0x4f8   :  { %v1722_v26 = vpop.f32.mrf.mxu1 }
 0x4f9   :  { %v2491_v8 = vadd.f32 %v1722_v26, %v1721_v44 }
 0x4fa   :  { %v1724_v54 = vpop.f32.mrf.mxu1 }
 0x4fc   :  { %v1725_v52 = vpop.f32.mrf.mxu1 }
 0x4fd   :  { %v2493_v47 = vadd.f32 %v1725_v52, %v1724_v54 }
 0x4fe   :  { %v1727_v2 = vpop.f32.mrf.mxu1 }
 0x500   :  { %v1728_v1 = vpop.f32.mrf.mxu1 }
 0x501   :  { %v2497_v34 = vadd.f32 %v1728_v1, %v1727_v2 }
 0x502   :  { %v1730_v4 = vpop.f32.mrf.mxu1 }
 0x504   :  { %v1731_v32 = vpop.f32.mrf.mxu1 }
 0x505   :  { %v1732_v40 = vadd.f32 %v1731_v32, %v1730_v4 }
 0x506   :  { %v1733_v43 = vpop.f32.mrf.mxu1 }
 0x507   :  { %v1142_v36 = vpack.c.bf16 %v1732_v40, %v2497_v34 }
 0x508   :  { %v1734_v30 = vpop.f32.mrf.mxu1 }
 0x509   :  { %v1735_v22 = vadd.f32 %v1734_v30, %v1733_v43 }
 0x50a   :  { %v1736_v25 = vpop.f32.mrf.mxu1 }
 0x50c   :  { %v1737_v44 = vpop.f32.mrf.mxu1 }
 0x50d   :  { %v1738_v26 = vadd.f32 %v1737_v44, %v1736_v25 }
 0x50e   :  { %v1739_v54 = vpop.f32.mrf.mxu1 }
 0x50f   :  { %v1143_v52 = vpack.c.bf16 %v1738_v26, %v1735_v22 }
 0x510   :  { %v1740_v42 = vpop.f32.mrf.mxu1 }
 0x511   :  { %v2500_v23 = vadd.f32 %v1740_v42, %v1739_v54 }
 0x512   :  { %v1742_v24 = vpop.f32.mrf.mxu1 }
 0x514   :  { %v1743_v35 = vpop.f32.mrf.mxu1 }
 0x515   :  { %v2502_v2 = vadd.f32 %v1743_v35, %v1742_v24 }
 0x516   :  { %v1745_v1 = vpop.f32.mrf.mxu1 }
 0x517   :  { %v1144_v4 = vpack.c.bf16 %v2502_v2, %v2500_v23 }
 0x518   :  { %v1746_v32 = vpop.f32.mrf.mxu1 }
 0x519   :  { %v1747_v34 = vadd.f32 %v1746_v32, %v1745_v1 }
 0x51a   :  { %v1748_v40 = vpop.f32.mrf.mxu1 }
 0x51c   :  { %v1749_v43 = vpop.f32.mrf.mxu1 }
 0x51d   :  { %v1750_v30 = vadd.f32 %v1749_v43, %v1748_v40 }
 0x51e   :  { %v1751_v56 = vpop.f32.mrf.mxu1 }
 0x51f   :  { %v1145_v25 = vpack.c.bf16 %v1750_v30, %v1747_v34 }
 0x520   :  { %v1752_v44 = vpop.f32.mrf.mxu1 }
 0x522   :  { %v1754_v22 = vpop.f32.mrf.mxu1 }
 0x524   :  { %v1755_v26 = vpop.f32.mrf.mxu1 }
 0x526   :  { %v1757_v42 = vpop.f32.mrf.mxu1 }
 0x528   :  { %v1758_v54 = vpop.f32.mrf.mxu1 }
 0x52a   :  { %v1760_v62 = vpop.f32.mrf.mxu1 }
 0x52c   :  { %v1761_v49 = vpop.f32.mrf.mxu1 }
 0x52d   :  { %v1762_v37 = vadd.f32 %v1761_v49, %v1760_v62 }
 0x52e   :  { %v1763_v24 = vpop.f32.mrf.mxu1 }
 0x530   :  { %v1764_v35 = vpop.f32.mrf.mxu1 }
 0x531   :  { %v1765_v39 = vadd.f32 %v1764_v35, %v1763_v24 }
 0x532   :  { %v1766_v20 = vpop.f32.mrf.mxu1 }
 0x534   :  { %v1767_v27 = vpop.f32.mrf.mxu1 }
 0x535   :  { %v1768_v53 = vadd.f32 %v1767_v27, %v1766_v20  ;;  %v2742_v27 = vld [vmem:[#allocation31_spill] sm:$0xff]  ;;  %v2743_v20 = vld [vmem:[#allocation32_spill] sm:$0xff] }
 0x536   :  { %v1769_v31 = vpop.f32.mrf.mxu1 }
 0x537   :  { %v1148_v33 = vpack.c.bf16 %v1768_v53, %v1765_v39  ;;  %v2721_v39 = vpack.c.bf16 %v2475_v29, %v2473_v45  ;;  %v2735_v53 = vld [vmem:[#allocation24_spill] sm:$0xff] }
 0x538   :  { %v1770_v23 = vpop.f32.mrf.mxu1 }
 0x539   :  { %v1771_v57 = vadd.f32 %v1770_v23, %v1769_v31  ;;  %v2741_v31 = vld [vmem:[#allocation30_spill] sm:$0xff] }
 0x53a   :  { %v1772_v2 = vpop.f32.mrf.mxu1 }
 0x53c   :  { %v1773_v1 = vpop.f32.mrf.mxu1 }
 0x53d   :  { %v1774_v0 = vadd.f32 %v1773_v1, %v1772_v2 }
 0x53e   :  { %v1775_v32 = vpop.f32.mrf.mxu1 }
 0x53f   :  { %v1149_v46 = vpack.c.bf16 %v1774_v0, %v1771_v57  ;;  %v2736_v0 = vld [vmem:[#allocation25_spill] sm:$0xff] }
 0x540   :  { %v1776_v61 = vpop.f32.mrf.mxu1 }
 0x541   :  { %v1777_v7 = vadd.f32 %v1776_v61, %v1775_v32  ;;  %v2740_v61 = vld [vmem:[#allocation29_spill] sm:$0xff] }
 0x542   :  { %v1778_v40 = vpop.f32.mrf.mxu1 }
 0x544   :  { %v1779_v43 = vpop.f32.mrf.mxu1 }
 0x545   :  { %v1780_v41 = vadd.f32 %v1779_v43, %v1778_v40  ;;  %v2718_v40 = vpack.c.bf16 %v2493_v47, %v2491_v8 }
 0x546   :  { %v1781_v34 = vpop.f32.mrf.mxu1 }
 0x547   :  { %v1150_v60 = vpack.c.bf16 %v1780_v41, %v1777_v7  ;;  %v2737_v7 = vld [vmem:[#allocation26_spill] sm:$0xff]  ;;  %v2738_v41 = vld [vmem:[#allocation27_spill] sm:$0xff] }
 0x548   :  { %v1782_v30 = vpop.f32.mrf.mxu1 }
 0x549   :  { %v1783_v63 = vadd.f32 %v1782_v30, %v1781_v34 }
 0x54a   :  { %v1784_v59 = vpop.f32.mrf.mxu1 }
 0x54c   :  { %v1785_v5 = vpop.f32.mrf.mxu1 }
 0x54d   :  { %v1786_v58 = vadd.f32 %v1785_v5, %v1784_v59  ;;  %v1759_v5 = vadd.f32 %v1758_v54, %v1757_v42  ;;  %v2739_v59 = vld [vmem:[#allocation28_spill] sm:$0xff] }
 0x54f   :  { %v1151_v3 = vpack.c.bf16 %v1786_v58, %v1783_v63  ;;  %v1756_v58 = vadd.f32 %v1755_v26, %v1754_v22  ;;  %v1147_v63 = vpack.c.bf16 %v1762_v37, %v1759_v5  ;;  %v2723_v37 = vpack.c.bf16 %v2463_v55, %v2461_v51  ;;  %v2558_v51 = vld [vmem:[%s2601_s3] ss:$0 sm:$0xff]  ;;  %s2136_s3 = smov [#allocation8]  }
 0x550   :  { %s1357_s7 = sshll.u32 %s2136_s3, 4  ;;  %s1358_s7 = int_to_ptr.vmem [resolvable:$true] %s1357_s7 }
 0x551   :  { %1787 = vmatprep.subr.bf16.mxu0 %v1151_v3  ;;  %v2719_v3 = vpack.c.bf16 %v2487_v6, %v2485_v28  ;;  %s2103_s8 = scalar_lea.vmem %s1358_s7, 4096  ;;  %p2108_p2 = scmp.lt.s32.totalorder %s1358_s7, %s1358_s7 }
 0x552   :  { %1788 = vmatpush3.bf16.msra.mxu0 %v1143_v52  ;;  %p2104_p1 = scmp.ne.s32.totalorder %s1358_s7, %s2103_s8  ;;  %p2109_p3 = scmp.lt.s32.totalorder %s2103_s8, %s2103_s8 }
 0x553   :  { %1789 = vmatprep.subr.bf16.mxu0 %v1150_v60  ;;  %v1753_v60 = vadd.f32 %v1752_v44, %v1751_v56 }
 0x554   :  { %p2110_p4 = por %p2109_p3, %p2108_p2 }
 0x555   :  { %v1146_v57 = vpack.c.bf16 %v1756_v58, %v1753_v60 }
 0x556   :  { %1790 = vmatpush3.bf16.msra.mxu0 %v1142_v36  ;;  %p2111_p5 = pnand %p2110_p4, %p2104_p1 }
 0x557   :  { %1791 = vmatprep.subr.bf16.mxu0 %v1149_v46  ;;  %v2720_v46 = vpack.c.bf16 %v2481_v38, %v2479_v50 }
 0x55a   :  { %1792 = vmatpush3.bf16.msra.mxu0 %v2718_v40 }
 0x55b   :  { %1793 = vmatprep.subr.bf16.mxu0 %v1148_v33  ;;  %v2722_v33 = vpack.c.bf16 %v2469_v48, %v2467_v21 }
 0x55e   :  { %1794 = vmatpush3.bf16.msra.mxu0 %v2719_v3 }
 0x55f   :  { %1795 = vmatprep.subr.bf16.mxu0 %v1147_v63 }
 0x562   :  { %1796 = vmatpush3.bf16.msra.mxu0 %v2720_v46 }
 0x563   :  { %1797 = vmatprep.subr.bf16.mxu0 %v1146_v57 }
 0x566   :  { %1798 = vmatpush3.bf16.msra.mxu0 %v2721_v39 }
 0x567   :  { %1799 = vmatprep.subr.bf16.mxu0 %v1145_v25 }
 0x56a   :  { %1800 = vmatpush3.bf16.msra.mxu0 %v2722_v33 }
 0x56b   :  { %1801 = vmatprep.subr.bf16.mxu0 %v1144_v4 }
 0x56e   :  { %1802 = vmatpush3.bf16.msra.mxu0 %v2723_v37 }
 0x571   :  { %1192 = vmatmul.mubr.bf16.vlgmr.msra.gmra.mxu0 %v2178_v9  ;;  %v2724_v9 = vld [vmem:[#allocation13_spill] sm:$0xff] }
 0x572   :  { %1199 = vmatprep.mubr.bf16.mxu0 %v2180_v10  ;;  %v2725_v10 = vld [vmem:[#allocation14_spill] sm:$0xff] }
 0x579   :  { %1200 = vmatmul.mubr.bf16.gmra.mxu0 %v2184_v11  ;;  %v2726_v11 = vld [vmem:[#allocation15_spill] sm:$0xff] }
 0x57a   :  { %1207 = vmatprep.mubr.bf16.mxu0 %v2186_v12  ;;  %v2727_v12 = vld [vmem:[#allocation16_spill] sm:$0xff] }
 0x581   :  { %1208 = vmatmul.mubr.bf16.gmra.mxu0 %v2190_v13  ;;  %v2728_v13 = vld [vmem:[#allocation17_spill] sm:$0xff] }
 0x582   :  { %1215 = vmatprep.mubr.bf16.mxu0 %v2192_v14  ;;  %v2729_v14 = vld [vmem:[#allocation18_spill] sm:$0xff] }
 0x589   :  { %1216 = vmatmul.mubr.bf16.gmra.mxu0 %v2196_v15  ;;  %v2730_v15 = vld [vmem:[#allocation19_spill] sm:$0xff] }
 0x58a   :  { %1223 = vmatprep.mubr.bf16.mxu0 %v2198_v16  ;;  %v2731_v16 = vld [vmem:[#allocation20_spill] sm:$0xff] }
 0x591   :  { %1224 = vmatmul.mubr.bf16.gmra.mxu0 %v2202_v17  ;;  %v2732_v17 = vld [vmem:[#allocation21_spill] sm:$0xff] }
 0x592   :  { %1231 = vmatprep.mubr.bf16.mxu0 %v2204_v18  ;;  %v2733_v18 = vld [vmem:[#allocation22_spill] sm:$0xff] }
 0x599   :  { %1232 = vmatmul.mubr.bf16.gmra.mxu0 %v2208_v19  ;;  %v2734_v19 = vld [vmem:[#allocation23_spill] sm:$0xff] }
 0x59a   :  { %1239 = vmatprep.mubr.bf16.mxu0 %v2724_v9 }
 0x5a1   :  { %1240 = vmatmul.mubr.bf16.gmra.mxu0 %v2725_v10 }
 0x5a2   :  { %1247 = vmatprep.mubr.bf16.mxu0 %v2726_v11 }
 0x5a9   :  { %1248 = vmatmul.mubr.bf16.gmra.mxu0 %v2727_v12 }
 0x5aa   :  { %1255 = vmatprep.mubr.bf16.mxu0 %v2728_v13 }
 0x5b1   :  { %1256 = vmatmul.mubr.bf16.gmra.mxu0 %v2729_v14 }
 0x5b2   :  { %1263 = vmatprep.mubr.bf16.mxu0 %v2730_v15 }
 0x5b9   :  { %1264 = vmatmul.mubr.bf16.gmra.mxu0 %v2731_v16 }
 0x5ba   :  { %1271 = vmatprep.mubr.bf16.mxu0 %v2732_v17 }
 0x5c1   :  { %1272 = vmatmul.mubr.bf16.gmra.mxu0 %v2733_v18 }
 0x5c2   :  { %1279 = vmatprep.mubr.bf16.mxu0 %v2734_v19 }
 0x5c9   :  { %1280 = vmatmul.mubr.bf16.gmra.mxu0 %v2735_v53 }
 0x5ca   :  { %1287 = vmatprep.mubr.bf16.mxu0 %v2736_v0 }
 0x5d1   :  { %1288 = vmatmul.mubr.bf16.gmra.mxu0 %v2737_v7 }
 0x5d2   :  { %1295 = vmatprep.mubr.bf16.mxu0 %v2738_v41 }
 0x5d9   :  { %1296 = vmatmul.mubr.bf16.gmra.mxu0 %v2739_v59 }
 0x5da   :  { %1303 = vmatprep.mubr.bf16.mxu0 %v2740_v61 }
 0x5e1   :  { %1304 = vmatmul.mubr.bf16.gmra.mxu0 %v2741_v31 }
 0x5e2   :  { %1311 = vmatprep.mubr.bf16.mxu0 %v2742_v27 }
 0x5e9   :  { %1312 = vmatmul.mubr.bf16.gmra.mxu0 %v2743_v20 }
 0x631   :  { %v1803_v49 = vpop.f32.mrf.mxu0 }
 0x633   :  { %v1804_v55 = vpop.f32.mrf.mxu0 }
 0x634   :  { %v1805_v21 = vadd.f32 %v1804_v55, %v1803_v49 }
 0x635   :  { %v1806_v48 = vpop.f32.mrf.mxu0 }
 0x636   :  { %v1194_v45 = vadd.f32 %v1805_v21, %v2558_v51 }
 0x637   :  { %v1807_v29 = vpop.f32.mrf.mxu0 }
 0x638   :  { %1320 = vst [vmem:[#allocation8] sm:$0xff] %v1194_v45  ;;  %v1808_v50 = vadd.f32 %v1807_v29, %v1806_v48 }
 0x639   :  { %v1809_v38 = vpop.f32.mrf.mxu0 }
 0x63a   :  { %v1197_v28 = vadd.f32 %v1808_v50, %v2558_v51 }
 0x63b   :  { %v1810_v6 = vpop.f32.mrf.mxu0 }
 0x63c   :  { %1321 = vst [vmem:[#allocation8 + $0x8] sm:$0xff] %v1197_v28  ;;  %v1811_v56 = vadd.f32 %v1810_v6, %v1809_v38 }
 0x63d   :  { %v1812_v8 = vpop.f32.mrf.mxu0 }
 0x63e   :  { %v1202_v47 = vadd.f32 %v1811_v56, %v2558_v51 }
 0x63f   :  { %v1813_v62 = vpop.f32.mrf.mxu0 }
 0x640   :  { %1322 = vst [vmem:[#allocation8 + $0x10] sm:$0xff] %v1202_v47  ;;  %v1814_v36 = vadd.f32 %v1813_v62, %v1812_v8 }
 0x641   :  { %v1815_v52 = vpop.f32.mrf.mxu0 }
 0x642   :  { %v1205_v4 = vadd.f32 %v1814_v36, %v2558_v51 }
 0x643   :  { %v1816_v25 = vpop.f32.mrf.mxu0 }
 0x644   :  { %1323 = vst [vmem:[#allocation8 + $0x18] sm:$0xff] %v1205_v4  ;;  %v1817_v44 = vadd.f32 %v1816_v25, %v1815_v52 }
 0x645   :  { %v1818_v22 = vpop.f32.mrf.mxu0 }
 0x646   :  { %v1210_v26 = vadd.f32 %v1817_v44, %v2558_v51 }
 0x647   :  { %v1819_v42 = vpop.f32.mrf.mxu0 }
 0x648   :  { %1324 = vst [vmem:[#allocation8 + $0x20] sm:$0xff] %v1210_v26  ;;  %v1820_v54 = vadd.f32 %v1819_v42, %v1818_v22 }
 0x649   :  { %v1821_v24 = vpop.f32.mrf.mxu0 }
 0x64a   :  { %v1213_v35 = vadd.f32 %v1820_v54, %v2558_v51 }
 0x64b   :  { %v1822_v23 = vpop.f32.mrf.mxu0 }
 0x64c   :  { %1325 = vst [vmem:[#allocation8 + $0x28] sm:$0xff] %v1213_v35  ;;  %v1823_v2 = vadd.f32 %v1822_v23, %v1821_v24 }
 0x64d   :  { %v1824_v1 = vpop.f32.mrf.mxu0 }
 0x64e   :  { %v1218_v32 = vadd.f32 %v1823_v2, %v2558_v51 }
 0x64f   :  { %v1825_v43 = vpop.f32.mrf.mxu0 }
 0x650   :  { %1326 = vst [vmem:[#allocation8 + $0x30] sm:$0xff] %v1218_v32  ;;  %v1826_v34 = vadd.f32 %v1825_v43, %v1824_v1 }
 0x651   :  { %v1827_v30 = vpop.f32.mrf.mxu0 }
 0x652   :  { %v1221_v40 = vadd.f32 %v1826_v34, %v2558_v51 }
 0x653   :  { %v1828_v5 = vpop.f32.mrf.mxu0 }
 0x654   :  { %1327 = vst [vmem:[#allocation8 + $0x38] sm:$0xff] %v1221_v40  ;;  %v1829_v58 = vadd.f32 %v1828_v5, %v1827_v30 }
 0x655   :  { %v1830_v63 = vpop.f32.mrf.mxu0 }
 0x656   :  { %v1226_v3 = vadd.f32 %v1829_v58, %v2558_v51 }
 0x657   :  { %v1831_v60 = vpop.f32.mrf.mxu0 }
 0x658   :  { %1328 = vst [vmem:[#allocation8 + $0x40] sm:$0xff] %v1226_v3  ;;  %v1832_v57 = vadd.f32 %v1831_v60, %v1830_v63 }
 0x659   :  { %v1833_v46 = vpop.f32.mrf.mxu0 }
 0x65a   :  { %v1229_v39 = vadd.f32 %v1832_v57, %v2558_v51 }
 0x65b   :  { %v1834_v33 = vpop.f32.mrf.mxu0 }
 0x65c   :  { %1329 = vst [vmem:[#allocation8 + $0x48] sm:$0xff] %v1229_v39  ;;  %v1835_v37 = vadd.f32 %v1834_v33, %v1833_v46 }
 0x65d   :  { %v1836_v9 = vpop.f32.mrf.mxu0 }
 0x65e   :  { %v1234_v10 = vadd.f32 %v1835_v37, %v2558_v51 }
 0x65f   :  { %v1837_v11 = vpop.f32.mrf.mxu0 }
 0x660   :  { %1330 = vst [vmem:[#allocation8 + $0x50] sm:$0xff] %v1234_v10  ;;  %v1838_v12 = vadd.f32 %v1837_v11, %v1836_v9 }
 0x661   :  { %v1839_v13 = vpop.f32.mrf.mxu0 }
 0x662   :  { %v1237_v14 = vadd.f32 %v1838_v12, %v2558_v51 }
 0x663   :  { %v1840_v15 = vpop.f32.mrf.mxu0 }
 0x664   :  { %1331 = vst [vmem:[#allocation8 + $0x58] sm:$0xff] %v1237_v14  ;;  %v1841_v16 = vadd.f32 %v1840_v15, %v1839_v13 }
 0x665   :  { %v1842_v17 = vpop.f32.mrf.mxu0 }
 0x666   :  { %v1242_v18 = vadd.f32 %v1841_v16, %v2558_v51 }
 0x667   :  { %v1843_v19 = vpop.f32.mrf.mxu0 }
 0x668   :  { %1332 = vst [vmem:[#allocation8 + $0x60] sm:$0xff] %v1242_v18  ;;  %v1844_v53 = vadd.f32 %v1843_v19, %v1842_v17 }
 0x669   :  { %v1845_v0 = vpop.f32.mrf.mxu0 }
 0x66a   :  { %v1245_v7 = vadd.f32 %v1844_v53, %v2558_v51 }
 0x66b   :  { %v1846_v41 = vpop.f32.mrf.mxu0 }
 0x66c   :  { %1333 = vst [vmem:[#allocation8 + $0x68] sm:$0xff] %v1245_v7  ;;  %v1847_v59 = vadd.f32 %v1846_v41, %v1845_v0 }
 0x66d   :  { %v1848_v61 = vpop.f32.mrf.mxu0 }
 0x66e   :  { %v1250_v31 = vadd.f32 %v1847_v59, %v2558_v51 }
 0x66f   :  { %v1849_v27 = vpop.f32.mrf.mxu0 }
 0x670   :  { %1334 = vst [vmem:[#allocation8 + $0x70] sm:$0xff] %v1250_v31  ;;  %v1850_v20 = vadd.f32 %v1849_v27, %v1848_v61 }
 0x671   :  { %v1851_v49 = vpop.f32.mrf.mxu0 }
 0x672   :  { %v1253_v55 = vadd.f32 %v1850_v20, %v2558_v51 }
 0x673   :  { %v1852_v21 = vpop.f32.mrf.mxu0 }
 0x674   :  { %1335 = vst [vmem:[#allocation8 + $0x78] sm:$0xff] %v1253_v55  ;;  %v1853_v48 = vadd.f32 %v1852_v21, %v1851_v49 }
 0x675   :  { %v1854_v45 = vpop.f32.mrf.mxu0 }
 0x676   :  { %v1258_v29 = vadd.f32 %v1853_v48, %v2558_v51 }
 0x677   :  { %v1855_v50 = vpop.f32.mrf.mxu0 }
 0x678   :  { %1336 = vst [vmem:[#allocation8 + $0x80] sm:$0xff] %v1258_v29  ;;  %v1856_v38 = vadd.f32 %v1855_v50, %v1854_v45 }
 0x679   :  { %v1857_v28 = vpop.f32.mrf.mxu0 }
 0x67a   :  { %v1261_v6 = vadd.f32 %v1856_v38, %v2558_v51 }
 0x67b   :  { %v1858_v56 = vpop.f32.mrf.mxu0 }
 0x67c   :  { %1337 = vst [vmem:[#allocation8 + $0x88] sm:$0xff] %v1261_v6  ;;  %v1859_v8 = vadd.f32 %v1858_v56, %v1857_v28 }
 0x67d   :  { %v1860_v47 = vpop.f32.mrf.mxu0 }
 0x67e   :  { %v1266_v62 = vadd.f32 %v1859_v8, %v2558_v51 }
 0x67f   :  { %v1861_v36 = vpop.f32.mrf.mxu0 }
 0x680   :  { %1338 = vst [vmem:[#allocation8 + $0x90] sm:$0xff] %v1266_v62  ;;  %v1862_v52 = vadd.f32 %v1861_v36, %v1860_v47 }
 0x681   :  { %v1863_v4 = vpop.f32.mrf.mxu0 }
 0x682   :  { %v1269_v25 = vadd.f32 %v1862_v52, %v2558_v51 }
 0x683   :  { %v1864_v44 = vpop.f32.mrf.mxu0 }
 0x684   :  { %1339 = vst [vmem:[#allocation8 + $0x98] sm:$0xff] %v1269_v25  ;;  %v1865_v22 = vadd.f32 %v1864_v44, %v1863_v4 }
 0x685   :  { %v1866_v26 = vpop.f32.mrf.mxu0 }
 0x686   :  { %v1274_v42 = vadd.f32 %v1865_v22, %v2558_v51 }
 0x687   :  { %v1867_v54 = vpop.f32.mrf.mxu0 }
 0x688   :  { %1340 = vst [vmem:[#allocation8 + $0xa0] sm:$0xff] %v1274_v42  ;;  %v1868_v24 = vadd.f32 %v1867_v54, %v1866_v26 }
 0x689   :  { %v1869_v35 = vpop.f32.mrf.mxu0 }
 0x68a   :  { %v1277_v23 = vadd.f32 %v1868_v24, %v2558_v51 }
 0x68b   :  { %v1870_v2 = vpop.f32.mrf.mxu0 }
 0x68c   :  { %1341 = vst [vmem:[#allocation8 + $0xa8] sm:$0xff] %v1277_v23  ;;  %v1871_v1 = vadd.f32 %v1870_v2, %v1869_v35 }
 0x68d   :  { %v1872_v32 = vpop.f32.mrf.mxu0 }
 0x68e   :  { %v1282_v43 = vadd.f32 %v1871_v1, %v2558_v51 }
 0x68f   :  { %v1873_v34 = vpop.f32.mrf.mxu0 }
 0x690   :  { %1342 = vst [vmem:[#allocation8 + $0xb0] sm:$0xff] %v1282_v43  ;;  %v1874_v30 = vadd.f32 %v1873_v34, %v1872_v32 }
 0x691   :  { %v1875_v40 = vpop.f32.mrf.mxu0 }
 0x692   :  { %v1285_v5 = vadd.f32 %v1874_v30, %v2558_v51 }
 0x693   :  { %v1876_v58 = vpop.f32.mrf.mxu0 }
 0x694   :  { %1343 = vst [vmem:[#allocation8 + $0xb8] sm:$0xff] %v1285_v5  ;;  %v1877_v63 = vadd.f32 %v1876_v58, %v1875_v40 }
 0x695   :  { %v1878_v3 = vpop.f32.mrf.mxu0 }
 0x696   :  { %v1290_v60 = vadd.f32 %v1877_v63, %v2558_v51 }
 0x697   :  { %v1879_v57 = vpop.f32.mrf.mxu0 }
 0x698   :  { %1344 = vst [vmem:[#allocation8 + $0xc0] sm:$0xff] %v1290_v60  ;;  %v1880_v46 = vadd.f32 %v1879_v57, %v1878_v3 }
 0x699   :  { %v1881_v39 = vpop.f32.mrf.mxu0 }
 0x69a   :  { %v1293_v33 = vadd.f32 %v1880_v46, %v2558_v51 }
 0x69b   :  { %v1882_v37 = vpop.f32.mrf.mxu0 }
 0x69c   :  { %1345 = vst [vmem:[#allocation8 + $0xc8] sm:$0xff] %v1293_v33  ;;  %v1883_v9 = vadd.f32 %v1882_v37, %v1881_v39 }
 0x69d   :  { %v1884_v10 = vpop.f32.mrf.mxu0 }
 0x69e   :  { %v1298_v11 = vadd.f32 %v1883_v9, %v2558_v51 }
 0x69f   :  { %v1885_v12 = vpop.f32.mrf.mxu0 }
 0x6a0   :  { %1346 = vst [vmem:[#allocation8 + $0xd0] sm:$0xff] %v1298_v11  ;;  %v1886_v13 = vadd.f32 %v1885_v12, %v1884_v10 }
 0x6a1   :  { %v1887_v14 = vpop.f32.mrf.mxu0 }
 0x6a2   :  { %v1301_v15 = vadd.f32 %v1886_v13, %v2558_v51 }
 0x6a3   :  { %v1888_v16 = vpop.f32.mrf.mxu0 }
 0x6a4   :  { %1347 = vst [vmem:[#allocation8 + $0xd8] sm:$0xff] %v1301_v15  ;;  %v1889_v17 = vadd.f32 %v1888_v16, %v1887_v14 }
 0x6a5   :  { %v1890_v18 = vpop.f32.mrf.mxu0 }
 0x6a6   :  { %v1306_v19 = vadd.f32 %v1889_v17, %v2558_v51 }
 0x6a7   :  { %v1891_v53 = vpop.f32.mrf.mxu0 }
 0x6a8   :  { %1348 = vst [vmem:[#allocation8 + $0xe0] sm:$0xff] %v1306_v19  ;;  %v1892_v0 = vadd.f32 %v1891_v53, %v1890_v18 }
 0x6a9   :  { %v1893_v7 = vpop.f32.mrf.mxu0 }
 0x6aa   :  { %v1309_v41 = vadd.f32 %v1892_v0, %v2558_v51 }
 0x6ab   :  { %v1894_v59 = vpop.f32.mrf.mxu0 }
 0x6ac   :  { %1349 = vst [vmem:[#allocation8 + $0xe8] sm:$0xff] %v1309_v41  ;;  %v1895_v61 = vadd.f32 %v1894_v59, %v1893_v7 }
 0x6ad   :  { %v1896_v31 = vpop.f32.mrf.mxu0 }
 0x6ae   :  { %v1314_v27 = vadd.f32 %v1895_v61, %v2558_v51 }
 0x6af   :  { %v1897_v20 = vpop.f32.mrf.mxu0 }
 0x6b0   :  { %1350 = vst [vmem:[#allocation8 + $0xf0] sm:$0xff] %v1314_v27  ;;  %v1898_v49 = vadd.f32 %v1897_v20, %v1896_v31 }
 0x6b2   :  { %v1317_v55 = vadd.f32 %v1898_v49, %v2558_v51 }
 0x6b4   :  { %1351 = vst [vmem:[#allocation8 + $0xf8] sm:$0xff] %v1317_v55 }
 0x6b5   :  { %2114 = shalt.err (!%p2111_p5)
}
 0x6b6   :  { %1363 = dma.vmem_to_hbm [thread:$0]  %s1358_s7, 4096, %s2602_s4, [#allocation4], %s2133_s25, %s2133_s25, %s2134_s26  }
 0x6b7   :  { %2127 = dma.done.wait [#allocation4], 4096  }
 0x6b8   :  { %2128 = vsyncadd [#allocation4], 4294963200 }
 0x6b9   :  { %1367 = vsyncpa [#allocation3], 1 }
 0x6ba   :  { %1368 = vsyncpa [#allocation6], 1 }
 0x6bb   :  { %1369 = vsyncpa [#allocation4], 1 }

</bundles_post_ra>
